<compile_context>
chip_gen: v7x
topology: tpu7x:2x2x1
jax: 0.10.0
libtpu: 0.0.40
codegen_flags: <defaults>
</compile_context>

<pallas_src>
import functools

import jax
import jax.numpy as jnp
from jax import lax
from jax.experimental import pallas as pl
from jax.experimental.pallas import tpu as pltpu


# Contract the LAST dim of both operands: A[m, k] x B[n, k] -> [m, n]
# (A @ B.T without materializing the transpose; weights stay in their native
# PyTorch nn.Linear layouts: W_enc [d_sae, d_res], W_dec [d_res, d_sae]).
_DN_NT = (((1,), (1,)), ((), ()))


def _sae_kernel(x_ref, we_ref, be_ref, wd_ref, bd_ref,      # inputs
                acts_ref, xrec_ref, loss_ref,                # outputs
                xrec_acc, sp_acc):                           # f32 scratch
    j = pl.program_id(1)
    nj = pl.num_programs(1)

    x = x_ref[...]
    we = we_ref[...]
    wd = wd_ref[...]

    # ---- encode tile: acts = relu(x @ W_enc[j_tile].T + b_enc[j_tile])
    pre = lax.dot_general(x, we, _DN_NT, preferred_element_type=jnp.float32)
    pre = pre + be_ref[...].astype(jnp.float32)
    acts_f32 = jnp.maximum(pre, 0.0)                               # [TB, TS]
    acts_ref[...] = acts_f32.astype(acts_ref.dtype)

    # ---- decode partial: acts @ W_dec[:, j_tile].T -> [TB, d_res] (f32 acc)
    dec_part = lax.dot_general(acts_f32.astype(wd.dtype), wd, _DN_NT,
                               preferred_element_type=jnp.float32)

    # ---- sparsity partial: XLU cross-lane reduce (acts >= 0 so |acts| == acts)
    sp_part = jnp.sum(acts_f32, axis=-1, keepdims=True)            # [TB, 1]

    @pl.when(j == 0)
    def _first():                       # no zero-fill pass: write directly
        xrec_acc[...] = dec_part
        sp_acc[...] = sp_part

    @pl.when(j != 0)
    def _accum():
        xrec_acc[...] += dec_part
        sp_acc[...] += sp_part

    # ---- finalize on the last d_sae tile: decoder bias + both loss rows
    @pl.when(j == nj - 1)
    def _finalize():
        d_res = xrec_acc.shape[-1]
        inv_d_res = 1.0 / d_res
        x_rec = xrec_acc[...] + bd_ref[...].astype(jnp.float32)    # [TB, d_res]
        xrec_ref[...] = x_rec.astype(xrec_ref.dtype)
        diff = x_rec - x.astype(jnp.float32)
        dsq = diff * diff
        # Lane-dense (1, TB) loss rows via ones-vector matmuls, once per batch
        # tile (cheap: M = 1), avoiding transposes of (TB, 1) columns.
        ones_r = jnp.ones((1, d_res), jnp.float32)
        rec_row = lax.dot_general(ones_r, dsq, _DN_NT,
                                  preferred_element_type=jnp.float32)
        loss_ref[0:1, :] = rec_row * inv_d_res                     # mean over d_res
        sp_b = jnp.broadcast_to(sp_acc[...], dsq.shape)            # lane-broadcast
        sp_row = lax.dot_general(ones_r, sp_b, _DN_NT,
                                 preferred_element_type=jnp.float32)
        loss_ref[1:2, :] = sp_row * inv_d_res                      # == sp_acc, row form


# ----------------------------------------------------------------------------
# Wrapper helpers: generation-aware VMEM budget and tile selection.
# ----------------------------------------------------------------------------

def _padded_tile_bytes(shape, dtype):
    rows, cols = shape
    itemsize = jnp.dtype(dtype).itemsize
    sub = 8 * max(1, 4 // itemsize)            # 8 sublanes (f32), 16 (bf16), 32 (i8)
    prows = -(-rows // sub) * sub
    pcols = -(-cols // 128) * 128
    return prows * pcols * itemsize


def _vmem_capacity_bytes():
    try:
        cap = getattr(pltpu.get_tpu_info(), "vmem_capacity_bytes", None)
        if cap:
            return int(cap)
    except Exception:
        pass
    try:
        if "v7" in jax.devices()[0].device_kind.lower():
            return 64 << 20
    except Exception:
        pass
    return 128 << 20


def _aligned_divisors(dim, align):
    """128-aligned divisors of dim (descending); always includes dim itself
    (full-extent blocks need no alignment)."""
    divs = [d for d in range(align, dim, align) if dim % d == 0]
    divs.append(dim)
    return sorted(set(divs), reverse=True)


def sae_forward(x, W_enc, b_enc, W_dec, b_dec, sparsity_coeff=0.1, *,
                block_b=None, block_s=None, matmul_dtype=None,
                acts_dtype=None, weight_buffer_count=None):
    """SAE forward pass -> (loss_dict, total_loss, acts, x_reconstructed).

    x: [B, d_res]; W_enc: [d_sae, d_res]; W_dec: [d_res, d_sae]
    (PyTorch nn.Linear layouts, consumed as-is -- no wrapper transposes).

    matmul_dtype=jnp.bfloat16 casts x / W_enc / W_dec ONCE in the wrapper
    (halves weight HBM streaming, doubles MXU rate); in a training loop keep
    the weights persistently bf16 so even this cast disappears.  Decode
    accumulation and loss math stay f32.
    """
    orig_dtype = jnp.dtype(x.dtype)
    B, d_res = x.shape
    d_sae, d_res_e = W_enc.shape
    assert d_res_e == d_res and W_dec.shape == (d_res, d_sae)
    assert b_enc.shape == (d_sae,) and b_dec.shape == (d_res,)

    if matmul_dtype is not None and jnp.dtype(matmul_dtype) != orig_dtype:
        x = x.astype(matmul_dtype)
        W_enc = W_enc.astype(matmul_dtype)
        W_dec = W_dec.astype(matmul_dtype)

    out_dtype = orig_dtype
    acts_dtype = jnp.dtype(acts_dtype) if acts_dtype is not None else orig_dtype

    be = b_enc.reshape(1, d_sae)
    bd = b_dec.reshape(1, d_res)

    capacity = _vmem_capacity_bytes()
    budget = int(0.85 * capacity)
    wbuf = int(weight_buffer_count) if weight_buffer_count else 2

    def footprint(tb, ts):
        inputs = (2 * _padded_tile_bytes((tb, d_res), x.dtype)
                  + wbuf * _padded_tile_bytes((ts, d_res), W_enc.dtype)
                  + 2 * _padded_tile_bytes((1, ts), be.dtype)
                  + wbuf * _padded_tile_bytes((d_res, ts), W_dec.dtype)
                  + 2 * _padded_tile_bytes((1, d_res), bd.dtype))
        outputs = (2 * _padded_tile_bytes((tb, ts), acts_dtype)
                   + 2 * _padded_tile_bytes((tb, d_res), out_dtype)
                   + 2 * _padded_tile_bytes((2, tb), jnp.float32))
        scratch = (_padded_tile_bytes((tb, d_res), jnp.float32)
                   + _padded_tile_bytes((tb, 1), jnp.float32))
        # In-kernel temporaries: pre/acts_f32, casted acts for the decode
        # matmul, decode partial, and the finalize f32 x_rec / dsq slabs.
        temps = (2 * _padded_tile_bytes((tb, ts), jnp.float32)
                 + _padded_tile_bytes((tb, ts), W_dec.dtype)
                 + 2 * _padded_tile_bytes((tb, d_res), jnp.float32))
        return inputs + outputs + scratch + temps

    # Defaults sized toward the roofline knee (weights are re-streamed once per
    # batch tile, so arithmetic intensity per weight byte ~ 2*TB/itemsize);
    # the search below shrinks them to fit the generation's VMEM budget.
    if block_b is None:
        block_b = 1024 if jnp.dtype(x.dtype).itemsize <= 2 else 2048
    if block_s is None:
        block_s = 512

    b_all = _aligned_divisors(B, 128)
    b_cands = [t for t in b_all if t <= block_b] or [b_all[-1]]
    # Megacore (v7x): keep >= 2 batch tiles on the "parallel" axis when B allows.
    halves = [t for t in b_cands if t <= max(B // 2, 128)]
    if B >= 256 and halves:
        b_cands = halves
    s_all = _aligned_divisors(d_sae, 128)
    s_cands = [t for t in s_all if t <= block_s] or [s_all[-1]]

    TB, TS = b_cands[-1], s_cands[-1]          # smallest legal fallback
    found = False
    for min_ts in (min(512, s_cands[0]), s_cands[-1]):
        for tb in b_cands:
            for ts in (s for s in s_cands if s >= min_ts):
                if footprint(tb, ts) <= budget:
                    TB, TS, found = tb, ts, True
                    break
            if found:
                break
        if found:
            break
    n_b, n_s = B // TB, d_sae // TS

    fp = footprint(TB, TS)
    vmem_limit = int(min(0.95 * capacity, max(fp * 1.25 + (2 << 20), 32 << 20)))

    wkw = dict(pipeline_mode=pl.Buffered(wbuf)) if weight_buffer_count else {}
    in_specs = [
        pl.BlockSpec((TB, d_res), lambda i, j: (i, 0)),           # x (resident over j)
        pl.BlockSpec((TS, d_res), lambda i, j: (j, 0), **wkw),    # W_enc (native layout)
        pl.BlockSpec((1, TS),     lambda i, j: (0, j)),           # b_enc
        pl.BlockSpec((d_res, TS), lambda i, j: (0, j), **wkw),    # W_dec (native layout)
        pl.BlockSpec((1, d_res),  lambda i, j: (0, 0)),           # b_dec
    ]
    out_specs = [
        pl.BlockSpec((TB, TS),    lambda i, j: (i, j)),           # acts
        pl.BlockSpec((TB, d_res), lambda i, j: (i, 0)),           # x_rec (last-j write)
        pl.BlockSpec((2, TB),     lambda i, j: (0, i)),           # lane-dense loss slab
    ]
    out_shapes = (
        jax.ShapeDtypeStruct((B, d_sae), acts_dtype),             # acts
        jax.ShapeDtypeStruct((B, d_res), out_dtype),              # x_reconstructed
        jax.ShapeDtypeStruct((2, B), jnp.float32),                # [rec; sparsity]
    )

    o_item = jnp.dtype(out_dtype).itemsize
    a_item = jnp.dtype(acts_dtype).itemsize
    cost = pl.CostEstimate(
        flops=int(4 * B * d_res * d_sae + 2 * B * d_sae + 8 * B * d_res),
        transcendentals=0,
        bytes_accessed=int(
            B * d_res * x.dtype.itemsize
            + n_b * (W_enc.size * W_enc.dtype.itemsize
                     + W_dec.size * W_dec.dtype.itemsize)
            + d_sae * be.dtype.itemsize + d_res * bd.dtype.itemsize
            + B * d_sae * a_item + B * d_res * o_item + 2 * B * 4),
    )

    acts, x_rec, losses = pl.pallas_call(
        _sae_kernel,
        out_shape=out_shapes,
        grid_spec=pltpu.PrefetchScalarGridSpec(
            num_scalar_prefetch=0,
            grid=(n_b, n_s),                  # d_sae reduction axis is last
            in_specs=in_specs,
            out_specs=out_specs,
            scratch_shapes=[pltpu.VMEM((TB, d_res), jnp.float32),
                            pltpu.VMEM((TB, 1), jnp.float32)],
        ),
        compiler_params=pltpu.CompilerParams(
            dimension_semantics=("parallel", "arbitrary"),
            vmem_limit_bytes=vmem_limit,
        ),
        cost_estimate=cost,
    )(x, W_enc, be, W_dec, bd)

    rec_loss = losses[0]                                   # [B]
    sparsity_loss = losses[1]                              # [B]
    total_loss = rec_loss + sparsity_coeff * sparsity_loss
    loss_dict = {'reconstruction_loss': rec_loss, 'sparsity_loss': sparsity_loss}
    return loss_dict, total_loss, acts, x_rec


def _reference_forward(x, W_enc, b_enc, W_dec, b_dec, sparsity_coeff=0.1):
    hi = lax.Precision.HIGHEST
    pre = jnp.dot(x, W_enc.T, precision=hi) + b_enc
    acts = jnp.maximum(pre, 0.0)
    x_rec = jnp.dot(acts, W_dec.T, precision=hi) + b_dec
    rec = jnp.mean((x_rec - x) ** 2, axis=-1)
    sp = jnp.sum(jnp.abs(acts), axis=-1)
    return rec, sp, rec + sparsity_coeff * sp, acts, x_rec


if __name__ == "__main__":
    # Small demo: explicit 128-tiles -> grid (2 batch tiles, 2 d_sae tiles) so
    # the decode / sparsity accumulation path is exercised, plus one run with
    # automatic (generation-aware) tile selection.
    B, d_res, d_sae = 256, 128, 256
    sparsity_coeff = 0.1

    key = jax.random.PRNGKey(0)
    kx, kwe, kbe, kwd, kbd = jax.random.split(key, 5)

    lim_e = 1.0 / d_res ** 0.5
    lim_d = 1.0 / d_sae ** 0.5
    x = jax.random.normal(kx, (B, d_res), dtype=jnp.float32)
    W_enc = jax.random.uniform(kwe, (d_sae, d_res), jnp.float32, -lim_e, lim_e)
    b_enc = jax.random.uniform(kbe, (d_sae,), jnp.float32, -lim_e, lim_e)
    W_dec = jax.random.uniform(kwd, (d_res, d_sae), jnp.float32, -lim_d, lim_d)
    b_dec = jax.random.uniform(kbd, (d_res,), jnp.float32, -lim_d, lim_d)

    rec_r, sp_r, tot_r, acts_r, xrec_r = _reference_forward(
        x, W_enc, b_enc, W_dec, b_dec, sparsity_coeff)

    # 1) forced 2x2 grid (reduction over d_sae tiles)
    loss_dict, total_loss, acts, x_rec = sae_forward(
        x, W_enc, b_enc, W_dec, b_dec, sparsity_coeff,
        block_b=128, block_s=128)
    jax.block_until_ready((loss_dict, total_loss, acts, x_rec))

    assert acts.shape == (B, d_sae) and x_rec.shape == (B, d_res)
    assert total_loss.shape == (B,)
    assert jnp.allclose(acts, acts_r, rtol=1e-3, atol=1e-3)
    assert jnp.allclose(x_rec, xrec_r, rtol=1e-3, atol=1e-3)
    assert jnp.allclose(loss_dict['reconstruction_loss'], rec_r, rtol=1e-3, atol=1e-4)
    assert jnp.allclose(loss_dict['sparsity_loss'], sp_r, rtol=1e-3, atol=1e-2)
    assert jnp.allclose(total_loss, tot_r, rtol=1e-3, atol=1e-2)

    # 2) automatic, generation-aware tile selection (single d_sae tile here)
    loss_dict2, total_loss2, acts2, x_rec2 = sae_forward(
        x, W_enc, b_enc, W_dec, b_dec, sparsity_coeff)
    jax.block_until_ready((loss_dict2, total_loss2, acts2, x_rec2))
    assert jnp.allclose(acts2, acts_r, rtol=1e-3, atol=1e-3)
    assert jnp.allclose(x_rec2, xrec_r, rtol=1e-3, atol=1e-3)
    assert jnp.allclose(total_loss2, tot_r, rtol=1e-3, atol=1e-2)

    print("KERNEL_OK")
</pallas_src>

<mosaic_0001>
module attributes {stable_mosaic.version = 11 : i64} {
  func.func @_sae_kernel(%arg0: i32, %arg1: i32, %arg2: memref<128x128xf32, #tpu.memory_space<vmem>>, %arg3: memref<128x128xf32, #tpu.memory_space<vmem>>, %arg4: memref<1x128xf32, #tpu.memory_space<vmem>>, %arg5: memref<128x128xf32, #tpu.memory_space<vmem>>, %arg6: memref<1x128xf32, #tpu.memory_space<vmem>>, %arg7: memref<128x128xf32, #tpu.memory_space<vmem>>, %arg8: memref<128x128xf32, #tpu.memory_space<vmem>>, %arg9: memref<2x128xf32, #tpu.memory_space<vmem>>, %arg10: memref<128x128xf32, #tpu.memory_space<vmem>>, %arg11: memref<128x1xf32, #tpu.memory_space<vmem>>) attributes {dimension_semantics = [#tpu.dimension_semantics<parallel>, #tpu.dimension_semantics<arbitrary>], iteration_bounds = array<i64: 2, 2>, scalar_prefetch = 0 : i64, scratch_operands = 2 : i64, tpu.core_type = #tpu.core_type<tc>, window_params = [{transform_indices = @transform_0, window_bounds = array<i64: 128, 128>}, {transform_indices = @transform_1, window_bounds = array<i64: 128, 128>}, {transform_indices = @transform_2, window_bounds = array<i64: 1, 128>}, {transform_indices = @transform_3, window_bounds = array<i64: 128, 128>}, {pipeline_mode = #tpu.pipeline_mode<synchronous>, transform_indices = @transform_4, window_bounds = array<i64: 1, 128>}, {transform_indices = @transform_5, window_bounds = array<i64: 128, 128>}, {transform_indices = @transform_6, window_bounds = array<i64: 128, 128>}, {transform_indices = @transform_7, window_bounds = array<i64: 2, 128>}]} {
    %c0 = arith.constant 0 : index
    %c0_0 = arith.constant 0 : index
    %0 = vector.load %arg2[%c0, %c0_0] : memref<128x128xf32, #tpu.memory_space<vmem>>, vector<128x128xf32>
    %c0_1 = arith.constant 0 : index
    %c0_2 = arith.constant 0 : index
    %1 = vector.load %arg3[%c0_1, %c0_2] : memref<128x128xf32, #tpu.memory_space<vmem>>, vector<128x128xf32>
    %c0_3 = arith.constant 0 : index
    %c0_4 = arith.constant 0 : index
    %2 = vector.load %arg5[%c0_3, %c0_4] : memref<128x128xf32, #tpu.memory_space<vmem>>, vector<128x128xf32>
    %cst = arith.constant dense<0.000000e+00> : vector<128x128xf32>
    %3 = tpu.matmul %0, %1, %cst {dimension_numbers = #tpu.dot_dimension_numbers<[1], [1], [0], [0], [0, 0, 1, 0], [], []>} : vector<128x128xf32>, vector<128x128xf32>, vector<128x128xf32> -> vector<128x128xf32>
    %c0_5 = arith.constant 0 : index
    %c0_6 = arith.constant 0 : index
    %4 = vector.load %arg4[%c0_5, %c0_6] : memref<1x128xf32, #tpu.memory_space<vmem>>, vector<1x128xf32>
    %5 = vector.broadcast %4 : vector<1x128xf32> to vector<128x128xf32>
    %6 = arith.addf %3, %5 : vector<128x128xf32>
    %cst_7 = arith.constant 0.000000e+00 : f32
    %7 = vector.broadcast %cst_7 : f32 to vector<128x128xf32>
    %8 = arith.maximumf %6, %7 : vector<128x128xf32>
    %c0_8 = arith.constant 0 : index
    %c0_9 = arith.constant 0 : index
    %9 = vector.load %arg7[%c0_8, %c0_9] : memref<128x128xf32, #tpu.memory_space<vmem>>, vector<128x128xf32>
    tpu.vector_store %arg7[%c0_8, %c0_9], %8 {strides = array<i32>} : memref<128x128xf32, #tpu.memory_space<vmem>>, vector<128x128xf32>,
    %cst_10 = arith.constant dense<0.000000e+00> : vector<128x128xf32>
    %10 = tpu.matmul %8, %2, %cst_10 {dimension_numbers = #tpu.dot_dimension_numbers<[1], [1], [0], [0], [0, 0, 1, 0], [], []>} : vector<128x128xf32>, vector<128x128xf32>, vector<128x128xf32> -> vector<128x128xf32>
    %cst_11 = arith.constant dense<0.000000e+00> : vector<128xf32>
    %11 = vector.multi_reduction <add>, %8, %cst_11 [1] : vector<128x128xf32> to vector<128xf32>
    %12 = vector.shape_cast %11 : vector<128xf32> to vector<128x1xf32>
    %c0_i32 = arith.constant 0 : i32
    %13 = arith.cmpi eq, %arg1, %c0_i32 : i32
    %14 = arith.extui %13 : i1 to i32
    %c0_i32_12 = arith.constant 0 : i32
    %15 = arith.cmpi ne, %14, %c0_i32_12 : i32
    scf.if %15 {
      %c0_16 = arith.constant 0 : index
      %c0_17 = arith.constant 0 : index
      %22 = vector.load %arg10[%c0_16, %c0_17] : memref<128x128xf32, #tpu.memory_space<vmem>>, vector<128x128xf32>
      tpu.vector_store %arg10[%c0_16, %c0_17], %10 {strides = array<i32>} : memref<128x128xf32, #tpu.memory_space<vmem>>, vector<128x128xf32>,
      %c0_18 = arith.constant 0 : index
      %c0_19 = arith.constant 0 : index
      %23 = vector.load %arg11[%c0_18, %c0_19] : memref<128x1xf32, #tpu.memory_space<vmem>>, vector<128x1xf32>
      tpu.vector_store %arg11[%c0_18, %c0_19], %12 {strides = array<i32>} : memref<128x1xf32, #tpu.memory_space<vmem>>, vector<128x1xf32>,
    } else {
    }
    %c0_i32_13 = arith.constant 0 : i32
    %16 = arith.cmpi ne, %arg1, %c0_i32_13 : i32
    %17 = arith.extui %16 : i1 to i32
    %c0_i32_14 = arith.constant 0 : i32
    %18 = arith.cmpi ne, %17, %c0_i32_14 : i32
    scf.if %18 {
      %c0_16 = arith.constant 0 : index
      %c0_17 = arith.constant 0 : index
      %22 = vector.load %arg10[%c0_16, %c0_17] : memref<128x128xf32, #tpu.memory_space<vmem>>, vector<128x128xf32>
      %23 = arith.addf %22, %10 : vector<128x128xf32>
      %c0_18 = arith.constant 0 : index
      %c0_19 = arith.constant 0 : index
      %24 = vector.load %arg10[%c0_18, %c0_19] : memref<128x128xf32, #tpu.memory_space<vmem>>, vector<128x128xf32>
      tpu.vector_store %arg10[%c0_18, %c0_19], %23 {strides = array<i32>} : memref<128x128xf32, #tpu.memory_space<vmem>>, vector<128x128xf32>,
      %c0_20 = arith.constant 0 : index
      %c0_21 = arith.constant 0 : index
      %25 = vector.load %arg11[%c0_20, %c0_21] : memref<128x1xf32, #tpu.memory_space<vmem>>, vector<128x1xf32>
      %26 = arith.addf %25, %12 : vector<128x1xf32>
      %c0_22 = arith.constant 0 : index
      %c0_23 = arith.constant 0 : index
      %27 = vector.load %arg11[%c0_22, %c0_23] : memref<128x1xf32, #tpu.memory_space<vmem>>, vector<128x1xf32>
      tpu.vector_store %arg11[%c0_22, %c0_23], %26 {strides = array<i32>} : memref<128x1xf32, #tpu.memory_space<vmem>>, vector<128x1xf32>,
    } else {
    }
    %c1_i32 = arith.constant 1 : i32
    %19 = arith.cmpi eq, %arg1, %c1_i32 : i32
    %20 = arith.extui %19 : i1 to i32
    %c0_i32_15 = arith.constant 0 : i32
    %21 = arith.cmpi ne, %20, %c0_i32_15 : i32
    scf.if %21 {
      %c0_16 = arith.constant 0 : index
      %c0_17 = arith.constant 0 : index
      %22 = vector.load %arg10[%c0_16, %c0_17] : memref<128x128xf32, #tpu.memory_space<vmem>>, vector<128x128xf32>
      %c0_18 = arith.constant 0 : index
      %c0_19 = arith.constant 0 : index
      %23 = vector.load %arg6[%c0_18, %c0_19] : memref<1x128xf32, #tpu.memory_space<vmem>>, vector<1x128xf32>
      %24 = vector.broadcast %23 : vector<1x128xf32> to vector<128x128xf32>
      %25 = arith.addf %22, %24 : vector<128x128xf32>
      %c0_20 = arith.constant 0 : index
      %c0_21 = arith.constant 0 : index
      %26 = vector.load %arg8[%c0_20, %c0_21] : memref<128x128xf32, #tpu.memory_space<vmem>>, vector<128x128xf32>
      tpu.vector_store %arg8[%c0_20, %c0_21], %25 {strides = array<i32>} : memref<128x128xf32, #tpu.memory_space<vmem>>, vector<128x128xf32>,
      %27 = arith.subf %25, %0 : vector<128x128xf32>
      %28 = arith.mulf %27, %27 : vector<128x128xf32>
      %cst_22 = arith.constant 1.000000e+00 : f32
      %29 = vector.broadcast %cst_22 : f32 to vector<1x128xf32>
      %cst_23 = arith.constant dense<0.000000e+00> : vector<1x128xf32>
      %30 = tpu.matmul %29, %28, %cst_23 {dimension_numbers = #tpu.dot_dimension_numbers<[1], [1], [0], [0], [0, 0, 1, 0], [], []>} : vector<1x128xf32>, vector<128x128xf32>, vector<1x128xf32> -> vector<1x128xf32>
      %cst_24 = arith.constant 7.812500e-03 : f32
      %31 = vector.broadcast %cst_24 : f32 to vector<1x128xf32>
      %32 = arith.mulf %30, %31 : vector<1x128xf32>
      %c0_25 = arith.constant 0 : index
      %c0_26 = arith.constant 0 : index
      %33 = vector.load %arg9[%c0_25, %c0_26] : memref<2x128xf32, #tpu.memory_space<vmem>>, vector<1x128xf32>
      tpu.vector_store %arg9[%c0_25, %c0_26], %32 {strides = array<i32>} : memref<2x128xf32, #tpu.memory_space<vmem>>, vector<1x128xf32>,
      %c0_27 = arith.constant 0 : index
      %c0_28 = arith.constant 0 : index
      %34 = vector.load %arg11[%c0_27, %c0_28] : memref<128x1xf32, #tpu.memory_space<vmem>>, vector<128x1xf32>
      %35 = vector.shape_cast %34 : vector<128x1xf32> to vector<128x1xf32>
      %36 = vector.broadcast %35 : vector<128x1xf32> to vector<128x128xf32>
      %cst_29 = arith.constant dense<0.000000e+00> : vector<1x128xf32>
      %37 = tpu.matmul %29, %36, %cst_29 {dimension_numbers = #tpu.dot_dimension_numbers<[1], [1], [0], [0], [0, 0, 1, 0], [], []>} : vector<1x128xf32>, vector<128x128xf32>, vector<1x128xf32> -> vector<1x128xf32>
      %cst_30 = arith.constant 7.812500e-03 : f32
      %38 = vector.broadcast %cst_30 : f32 to vector<1x128xf32>
      %39 = arith.mulf %37, %38 : vector<1x128xf32>
      %c1 = arith.constant 1 : index
      %c0_31 = arith.constant 0 : index
      %40 = vector.load %arg9[%c1, %c0_31] : memref<2x128xf32, #tpu.memory_space<vmem>>, vector<1x128xf32>
      tpu.vector_store %arg9[%c1, %c0_31], %39 {strides = array<i32>} : memref<2x128xf32, #tpu.memory_space<vmem>>, vector<1x128xf32>,
    } else {
    }
    return
  }
  func.func @transform_0(%arg0: i32, %arg1: i32) -> (i32, i32) {
    %c0_i32 = arith.constant 0 : i32
    %c0_i32_0 = arith.constant 0 : i32
    return %arg0, %c0_i32 : i32, i32
  }
  func.func @transform_1(%arg0: i32, %arg1: i32) -> (i32, i32) {
    %c0_i32 = arith.constant 0 : i32
    %c0_i32_0 = arith.constant 0 : i32
    return %arg1, %c0_i32 : i32, i32
  }
  func.func @transform_2(%arg0: i32, %arg1: i32) -> (i32, i32) {
    %c0_i32 = arith.constant 0 : i32
    %c0_i32_0 = arith.constant 0 : i32
    return %c0_i32, %arg1 : i32, i32
  }
  func.func @transform_3(%arg0: i32, %arg1: i32) -> (i32, i32) {
    %c0_i32 = arith.constant 0 : i32
    %c0_i32_0 = arith.constant 0 : i32
    return %c0_i32, %arg1 : i32, i32
  }
  func.func @transform_4(%arg0: i32, %arg1: i32) -> (i32, i32) {
    %c0_i32 = arith.constant 0 : i32
    %c0_i32_0 = arith.constant 0 : i32
    %c0_i32_1 = arith.constant 0 : i32
    return %c0_i32, %c0_i32_0 : i32, i32
  }
  func.func @transform_5(%arg0: i32, %arg1: i32) -> (i32, i32) {
    %c0_i32 = arith.constant 0 : i32
    return %arg0, %arg1 : i32, i32
  }
  func.func @transform_6(%arg0: i32, %arg1: i32) -> (i32, i32) {
    %c0_i32 = arith.constant 0 : i32
    %c0_i32_0 = arith.constant 0 : i32
    return %arg0, %c0_i32 : i32, i32
  }
  func.func @transform_7(%arg0: i32, %arg1: i32) -> (i32, i32) {
    %c0_i32 = arith.constant 0 : i32
    %c0_i32_0 = arith.constant 0 : i32
    return %c0_i32, %arg0 : i32, i32
  }
}

</mosaic_0001>

<bundles_post_ra>
// kernel: tpu_custom_call.1
= control target key start
LH: loop header
LB: loop body
LE: loop exit
PB: predicated region body
PF: predicated region fallthrough
CT: control target
= control target key end

     0   :  { %s3406_s0 = inlined_call_operand.hbm [shape: f32[256,128], index: 0, kind: input, shape index: {}]   ;;  %s3407_s1 = inlined_call_operand.hbm [shape: f32[256,128], index: 1, kind: input, shape index: {}]   ;;  %s3408_s2 = inlined_call_operand.vmem [shape: f32[1,256], index: 2, kind: input, shape index: {}]   ;;  %s3409_s3 = inlined_call_operand.hbm [shape: f32[128,256], index: 3, kind: input, shape index: {}]   ;;  %s3410_s4 = inlined_call_operand.vmem [shape: f32[1,128], index: 4, kind: input, shape index: {}]   ;;  %s3411_s5 = inlined_call_operand.hbm [shape: f32[256,256], index: 5, kind: output, shape index: {0}]   ;;  %s3412_s6 = inlined_call_operand.hbm [shape: f32[256,128], index: 6, kind: output, shape index: {1}]   ;;  %s3413_s7 = inlined_call_operand.hbm [shape: f32[2,256], index: 7, kind: output, shape index: {2}]  }
   0x1   :  { %3443 = sst [smem:[#allocation32_spill]] %s3407_s1 }
   0x2   :  { %3444 = sst [smem:[#allocation33_spill]] %s3408_s2 }
   0x3   :  { %3445 = sst [smem:[#allocation34_spill]] %s3410_s4 }
   0x4   :  { %3446 = sst [smem:[#allocation35_spill]] %s3411_s5 }
   0x5   :  { %3447 = sst [smem:[#allocation36_spill]] %s3412_s6 }
   0x6   :  { %3448 = sst [smem:[#allocation37_spill]] %s3413_s7 }
   0x7   :  { %13 = vsyncpa [#allocation5], 0 }
   0x8   :  { %15 = vsyncpa [#allocation5 + $0x1], 0 }
   0x9   :  { %16 = vsyncpa [#allocation8], 0 }
   0xa   :  { %18 = vsyncpa [#allocation8 + $0x1], 0 }
   0xb   :  { %19 = vsyncpa [#allocation6], 0 }
   0xc   :  { %21 = vsyncpa [#allocation6 + $0x1], 0 }
   0xd   :  { %22 = vsyncpa [#allocation12], 0 }
   0xe   :  { %24 = vsyncpa [#allocation12 + $0x1], 0  ;;  %s2544_s24 = smov 0   ;;  %s2546_s25 = smov 0  }
   0xf   :  { %s2548_s26 = smov 0   ;;  %s2550_s27 = smov 0  }
  0x10   :  { %s2552_s28 = smov 0   ;;  %s2554_s29 = smov 0  }
  0x11   :  { %s2556_s30 = smov 0   ;;  %s2558_s8 = smov 0  }
  0x12   :  { %s2560_s9 = smov 0   ;;  %s2562_s10 = smov 0  }
  0x13   :  { %s2564_s11 = smov 0   ;;  %s2566_s12 = smov 0  }
  0x14   :  { %s2568_s13 = smov 0   ;;  %s2570_s14 = smov 0  }
  0x15 LB: > { %3449 = sst [smem:[#allocation18_spill]] %s2433_s24  ;;  %s2613_s15 = sadd.s32 4294967295, %s2485_s14   ;;  %s2485_s14 = sphi %s2570_s14, %s30_s14   ;;  %s2481_s13 = sphi %s2568_s13, %s3525_s13   ;;  %s2477_s12 = sphi %s2566_s12, %s3514_s12   ;;  %s2473_s11 = sphi %s2564_s11, %s3524_s11   ;;  %s2469_s10 = sphi %s2562_s10, %s3523_s10   ;;  %s2465_s9 = sphi %s2560_s9, %s3511_s9   ;;  %s2461_s8 = sphi %s2558_s8, %s3522_s8   ;;  %s2457_s30 = sphi %s2556_s30, %s3521_s30   ;;  %s2453_s29 = sphi %s2554_s29, %s3509_s29   ;;  %s2449_s28 = sphi %s2552_s28, %s3520_s28   ;;  %s2445_s27 = sphi %s2550_s27, %s3519_s27   ;;  %s2441_s26 = sphi %s2548_s26, %s3507_s26   ;;  %s2437_s25 = sphi %s2546_s25, %s3518_s25   ;;  %s2433_s24 = sphi %s2544_s24, %s3517_s24  }
  0x16   : > { %3450 = sst [smem:[#allocation19_spill]] %s2441_s26  ;;  %s39_s16 = sadd.s32 1, %s2477_s12 }
  0x17   : > { %3451 = sst [smem:[#allocation20_spill]] %s2453_s29  ;;  %p2616_p0 = scmp.ge.s32.totalorder %s39_s16, 2 }
  0x18   : > { %3452 = sst [smem:[#allocation21_spill]] %s2465_s9  ;;  %p3423_p1 = scmp.eq.s32.totalorder %s2485_s14, 0 }
  0x19   : > { %3453 = sst [smem:[#allocation22_spill]] %s2469_s10  ;;  %p3422_p2 = scmp.eq.s32.totalorder %s2613_s15, 0 }
  0x1a   : > { %3454 = sst [smem:[#allocation23_spill]] %s2473_s11  ;;  %s75_s18 = sadd.s32 1, %s2453_s29 }
  0x1b   : > { %3455 = sst [smem:[#allocation24_spill]] %s2477_s12  ;;  %s3527_s16 = smov (%p2616_p0, %s39_s16), 0 }
  0x1c   : > { %3456 = sst [smem:[#allocation25_spill]] %s2481_s13  ;;  %p82_p3 = scmp.ne.s32.totalorder %s2453_s29, %s2449_s28 }
  0x1d   : > { %3458 = sst [smem:[#allocation26_spill]] %s3527_s16  ;;  %p88_p4 = scmp.ne.s32.totalorder %s2449_s28, %s2445_s27 }
  0x1e   : > { %s2632_s19 = ssub.s32 %s2477_s12, %s3527_s16  ;;  %p84_p6 = por %p82_p3, %p3423_p1 }
  0x1f   : > { %p73_p5 = scmp.eq.s32.totalorder %s2632_s19, 0  ;;  %p2639_p7 = por %p88_p4, %p3422_p2 }
  0x20   : > { %p3421_p8 = scmp.lt.s32.totalorder %s2485_s14, 4  ;;  %s289_s22 = sand.u32 1, %s2485_s14  }
  0x21   : > { %s3459_s20 = scalar_select %p2639_p7, 1, 0 }
  0x22   : > { %s2645_s21 = scalar_select %p73_p5, %s2453_s29, %s75_s18  }
  0x23   : > { %s291_s23 = sand.u32 1, %s2453_s29   ;;  %s1591_s5 = sshll.u32 %s2477_s12, 11 }
  0x24   : > { %3460 = sst [smem:[#allocation27_spill]] %s2645_s21  ;;  %s1562_s7 = sshll.u32 %s291_s23, 7 }
  0x25   : > { %s3461_s1 = sld [smem:[#allocation32_spill]]  ;;  %s293_s11 = scalar_lea.vmem [#allocation7], %s1562_s7 }
  0x26   : > { %s300_s4 = sshll.u32 %s293_s11, 4  ;;  %p2659_p9 = pnand %p3421_p8, %p84_p6  ;;  %s2655_s4 = int_to_ptr.vmem [resolvable:$true] %s300_s4 }
  0x27   : > { %s320_s23 = scalar_lea.vmem [#allocation9], %s1562_s7 }
  0x28   : > { %s2664_s6 = sshll.u32 %s320_s23, 4  ;;  %p3425_p12 = pneg %p2659_p9  ;;  %s2698_s6 = int_to_ptr.vmem [resolvable:$true] %s2664_s6 }
  0x2b   : > { %s2653_s16 = scalar_lea.hbm %s3461_s1, %s1591_s5  ;;  %s2666_s5 = scalar_lea.sflag [#allocation8], %s289_s22 }
  0x2c   : > { %s2185_s27 = scalar_lea.hbm %s2653_s16, 2048  ;;  %s2190_s29 = scalar_lea.hbm %s3461_s1, 4096 }
  0x2d   : > { %p2186_p11 = scmp.ne.s32.totalorder %s2653_s16, %s2185_s27  ;;  %p2191_p4 = scmp.lt.u32.totalorder %s2653_s16, %s3461_s1 }
  0x2e   : > { %p2192_p5 = scmp.lt.u32.totalorder %s2190_s29, %s2185_s27  ;;  %p2194_p8 = scmp.lt.u32.totalorder %s2185_s27, %s2653_s16 }
  0x2f   : > { %p2188_p13 = pnand %p3425_p12, %p2186_p11 }
  0x30   : > { %p2193_p6 = por %p2192_p5, %p2191_p4 }
  0x31   : > { %p2189_p3 = pneg %p2188_p13 }
  0x32   : > { %p2195_p2 = por %p2194_p8, %p2193_p6 }
  0x34   : > { %p2196_p1 = pnand %p2195_p2, %p2189_p3 }
  0x36   : > { %2199 = shalt.err (!%p2196_p1)
}
  0x37   : > { %s2200_s7 = scalar_lea.vmem %s2655_s4, 2048  ;;  %s2487_s21 = smov [#allocation7]  }
  0x38   : > { %p2201_p11 = scmp.ne.s32.totalorder %s2655_s4, %s2200_s7  ;;  %s2205_s22 = sshll.u32 %s2487_s21, 4  ;;  %s2206_s22 = int_to_ptr.vmem [resolvable:$false] %s2205_s22 }
  0x39   : > { %s2207_s2 = scalar_lea.vmem %s2206_s22, 4096  ;;  %p2208_p7 = scmp.lt.s32.totalorder %s2655_s4, %s2206_s22 }
  0x3a   : > { %p2203_p13 = pnand %p2201_p11, %p3425_p12  ;;  %p2209_p4 = scmp.lt.s32.totalorder %s2207_s2, %s2200_s7 }
  0x3c   : > { %p2204_p10 = pneg %p2203_p13  ;;  %p2210_p5 = por %p2209_p4, %p2208_p7 }
  0x3e   : > { %p2211_p8 = pnand %p2210_p5, %p2204_p10 }
  0x40   : > { %2214 = shalt.err (!%p2211_p8)
}
  0x41   : > { %s3426_s29 = smov 128   ;;  %s3428_s10 = smov 8  }
  0x42   : > { %2004 = dma.hbm_to_vmem [thread:$0]  (!%p2659_p9), %s2653_s16, 2048, %s2655_s4, %s2666_s5, %s3426_s29, %s3426_s29, %s3428_s10  }
  0x43   : > { %p334_p1 = scmp.lt.s32.totalorder %s2485_s14, 5  ;;  %p3463_p2 = scmp.ge.s32.totalorder %s2485_s14, 1 }
  0x44   : > { %s3434_s27 = sadd.s32 4294967294, %s2485_s14   ;;  %s42_s11 = sadd.s32 1, %s2481_s13 }
  0x45   : > { %p2703_p7 = pnand %p3463_p2, %p334_p1  ;;  %s49_s7 = sadd.s32 1, %s2465_s9 }
  0x46   : > { %s3529_s11 = smov (!%p2616_p0, %s42_s11), %s2481_s13  ;;  %p56_p10 = scmp.ne.s32.totalorder %s2465_s9, %s2461_s8 }
  0x47   : > { %s3464_s23 = scalar_select %p2703_p7, 1, 0 }
  0x48   : > { %p3432_p3 = scmp.ne.s32.totalorder %s2461_s8, %s2457_s30  ;;  %p44_p6 = scmp.ge.s32.totalorder %s3529_s11, 2 }
  0x49   : > { %s176_s4 = sadd.s32 1, %s2441_s26  ;;  %p3465_p11 = scmp.eq.s32.totalorder %s2485_s14, 0 }
  0x4a   : > { %p3467_p4 = scmp.eq.s32.totalorder %s2613_s15, 0  ;;  %s3531_s11 = smov (%p44_p6, %s3529_s11), 0 }
  0x4b   : > { %p2723_p13 = por %p3465_p11, %p56_p10  ;;  %3469 = sst [smem:[#allocation28_spill]] %s3531_s11 }
  0x4c   : > { %p2732_p0 = por %p3467_p4, %p3432_p3  ;;  %p186_p5 = scmp.ne.s32.totalorder %s2441_s26, %s2437_s25 }
  0x4d   : > { %p187_p8 = scmp.eq.s32.totalorder %s2613_s15, 3  ;;  %s46_s21 = ssub.s32 %s2481_s13, %s3531_s11 }
  0x4e   : > { %s3468_s17 = scalar_select %p2732_p0, 1, 0 }
  0x4f   : > { %p192_p1 = scmp.ne.s32.totalorder %s2437_s25, %s2433_s24  ;;  %p47_p2 = scmp.eq.s32.totalorder %s46_s21, 0 }
  0x50   : > { %s173_s22 = sor.u32 %s2632_s19, %s46_s21  ;;  %p2746_p12 = por %p187_p8, %p186_p5 }
  0x51   : > { %p174_p11 = scmp.eq.s32.totalorder %s173_s22, 0  ;;  %p193_p6 = scmp.eq.s32.totalorder %s3434_s27, 3 }
  0x52   : > { %s3470_s2 = scalar_select %p2746_p12, 1, 0 }
  0x53   : > { %s2751_s29 = scalar_select %p47_p2, %s2465_s9, %s49_s7  }
  0x54   : > { %s2754_s10 = scalar_select %p174_p11, %s2441_s26, %s176_s4  }
  0x55   : > { %3471 = sst [smem:[#allocation29_spill]] %s2751_s29  ;;  %p2761_p4 = por %p187_p8, %p56_p10 }
  0x56   : > { %3472 = sst [smem:[#allocation30_spill]] %s2754_s10  ;;  %s268_s11 = sand.u32 1, %s2465_s9  }
  0x57   : > { %s3473_s1 = scalar_select %p2761_p4, 1, 0 }
  0x58   : > { %s1590_s24 = sshll.u32 %s2481_s13, 11  ;;  %p2767_p3 = por %p193_p6, %p192_p1 }
  0x59   : > { %p3475_p5 = scmp.ne.s32.totalorder %s2461_s8, %s2457_s30  ;;  %s1559_s7 = sshll.u32 %s268_s11, 7 }
  0x5a   : > { %s3474_s19 = scalar_select %p2767_p3, 1, 0 }
  0x5b   : > { %p2774_p0 = por %p193_p6, %p3475_p5  ;;  %s2781_s27 = scalar_lea.hbm %s3406_s0, %s1590_s24 }
  0x5c   : > { %s272_s29 = scalar_lea.vmem [#allocation4], %s1559_s7  ;;  %p3478_p10 = scmp.lt.s32.totalorder %s2485_s14, 4 }
  0x5d   : > { %s3476_s21 = scalar_select %p2774_p0, 1, 0 }
  0x5e   : > { %s279_s13 = sshll.u32 %s272_s29, 4  ;;  %p2787_p8 = pnand %p3478_p10, %p2723_p13  ;;  %s2791_s13 = int_to_ptr.vmem [resolvable:$true] %s279_s13 }
  0x5f   : > { %3477 = sst [smem:[#allocation31_spill]] %s3476_s21  ;;  %s1566_s9 = sshll.u32 %s2477_s12, 7 }
  0x60   : > { %s2797_s22 = scalar_lea.hbm %s3409_s3, %s1566_s9  ;;  %s2799_s10 = scalar_lea.sflag [#allocation5], %s268_s11 }
  0x61   : > { %s2215_s7 = scalar_lea.hbm %s2781_s27, 2048  ;;  %p2217_p2 = pneg %p2787_p8 }
  0x62   : > { %p2216_p1 = scmp.ne.s32.totalorder %s2781_s27, %s2215_s7  ;;  %s2220_s26 = scalar_lea.hbm %s3406_s0, 4096 }
  0x63   : > { %p2221_p6 = scmp.lt.u32.totalorder %s2781_s27, %s3406_s0  ;;  %p2222_p5 = scmp.lt.u32.totalorder %s2220_s26, %s2215_s7 }
  0x64   : > { %p2218_p13 = pnand %p2217_p2, %p2216_p1  ;;  %p2224_p0 = scmp.lt.u32.totalorder %s2215_s7, %s2781_s27 }
  0x65   : > { %p2223_p10 = por %p2222_p5, %p2221_p6 }
  0x66   : > { %p2219_p11 = pneg %p2218_p13 }
  0x67   : > { %p2225_p3 = por %p2224_p0, %p2223_p10 }
  0x69   : > { %p2226_p12 = pnand %p2225_p3, %p2219_p11 }
  0x6b   : > { %2229 = shalt.err (!%p2226_p12)
}
  0x6c   : > { %s2230_s9 = scalar_lea.vmem %s2791_s13, 2048  ;;  %s2490_s11 = smov [#allocation4]  }
  0x6d   : > { %p2231_p1 = scmp.ne.s32.totalorder %s2791_s13, %s2230_s9  ;;  %s2235_s4 = sshll.u32 %s2490_s11, 4  ;;  %s2236_s4 = int_to_ptr.vmem [resolvable:$false] %s2235_s4 }
  0x6e   : > { %s2237_s12 = scalar_lea.vmem %s2236_s4, 4096  ;;  %p2238_p7 = scmp.lt.s32.totalorder %s2791_s13, %s2236_s4 }
  0x6f   : > { %p2233_p13 = pnand %p2231_p1, %p2217_p2  ;;  %p2239_p6 = scmp.lt.s32.totalorder %s2237_s12, %s2230_s9 }
  0x71   : > { %p2234_p4 = pneg %p2233_p13  ;;  %p2240_p5 = por %p2239_p6, %p2238_p7 }
  0x73   : > { %p2241_p0 = pnand %p2240_p5, %p2234_p4 }
  0x75   : > { %2244 = shalt.err (!%p2241_p0)
}
  0x76   : > { %s3480_s26 = smov 8   ;;  %s3481_s21 = smov 128  }
  0x77   : > { %2001 = dma.hbm_to_vmem [thread:$0]  (!%p2787_p8), %s2781_s27, 2048, %s2791_s13, %s2799_s10, %s3481_s21, %s3481_s21, %s3480_s26  }
  0x78   : > { %s2245_s24 = scalar_lea.hbm %s2797_s22, 2048  ;;  %p3482_p7 = pneg %p2659_p9 }
  0x79   : > { %p2246_p12 = scmp.ne.s32.totalorder %s2797_s22, %s2245_s24  ;;  %s2250_s29 = scalar_lea.hbm %s3409_s3, 4096 }
  0x7a   : > { %p2251_p2 = scmp.lt.u32.totalorder %s2797_s22, %s3409_s3  ;;  %p2252_p11 = scmp.lt.u32.totalorder %s2250_s29, %s2245_s24 }
  0x7b   : > { %p2248_p3 = pnand %p2246_p12, %p3482_p7  ;;  %p2254_p1 = scmp.lt.u32.totalorder %s2245_s24, %s2797_s22 }
  0x7c   : > { %p2253_p10 = por %p2252_p11, %p2251_p2 }
  0x7d   : > { %p2249_p4 = pneg %p2248_p3 }
  0x7e   : > { %p2255_p13 = por %p2254_p1, %p2253_p10 }
  0x80   : > { %p2256_p6 = pnand %p2255_p13, %p2249_p4 }
  0x82   : > { %2259 = shalt.err (!%p2256_p6)
}
  0x83   : > { %s2260_s13 = scalar_lea.vmem %s2698_s6, 2048  ;;  %p3483_p5 = pmov %p3482_p7 }
  0x84   : > { %p2261_p8 = scmp.ne.s32.totalorder %s2698_s6, %s2260_s13  ;;  %s2491_s10 = smov [#allocation9]  }
  0x85   : > { %s2265_s27 = sshll.u32 %s2491_s10, 4  ;;  %s2266_s27 = int_to_ptr.vmem [resolvable:$false] %s2265_s27 }
  0x86   : > { %p2263_p0 = pnand %p2261_p8, %p3483_p5  ;;  %s2267_s11 = scalar_lea.vmem %s2266_s27, 4096 }
  0x87   : > { %p2268_p7 = scmp.lt.s32.totalorder %s2698_s6, %s2266_s27  ;;  %p2269_p3 = scmp.lt.s32.totalorder %s2267_s11, %s2260_s13 }
  0x88   : > { %p2264_p12 = pneg %p2263_p0 }
  0x89   : > { %p2270_p2 = por %p2269_p3, %p2268_p7 }
  0x8b   : > { %p2271_p11 = pnand %p2270_p2, %p2264_p12 }
  0x8d   : > { %2274 = shalt.err (!%p2271_p11)
}
  0x8e   : > { %s2492_s4 = smov 256   ;;  %p3484_p4 = scmp.ne.s32.totalorder %s3464_s23, 0 }
  0x8f   : > { %2007 = dma.hbm_to_vmem [thread:$0]  (!%p2659_p9), %s2797_s22, 2048, %s2698_s6, %s2666_s5, %s2492_s4, %s3481_s21, %s3480_s26  }
  0x90   : > { %338 = sbr.rel (%p3484_p4) target bundleno = 1210 (0x4ba), region = 40  ;;  %s2859_s12 = sand.u32 (!%p3484_p4), 1, %s2461_s8  }
  0x91   : > { %s1568_s24 = sshll.u32 (!%p3484_p4), %s2859_s12, 7  ;;  %s341_s7 = scalar_lea.sflag (!%p3484_p4), [#allocation5], %s2859_s12 }
  0x92   : > { %s2865_s18 = scalar_lea.vmem (!%p3484_p4), [#allocation4], %s1568_s24  ;;  %p3485_p10 = scmp.ne.s32.totalorder (!%p3484_p4), %s3468_s17, 0 }
  0x97   : > { %2416 = dma.done.wait (%p3485_p10), %s341_s7, 2048  }
  0x98   : > { %2418 = vsyncadd (%p3485_p10), %s341_s7, 4294965248  ;;  %s349_s6 = sand.u32 1, %s2613_s15   ;;  %s351_s5 = sand.u32 1, %s2449_s28  }
  0x99   : > { %s1569_s23 = sshll.u32 %s351_s5, 7  ;;  %s350_s22 = scalar_lea.sflag [#allocation8], %s349_s6 }
  0x9a   : > { %s2875_s26 = scalar_lea.vmem [#allocation7], %s1569_s23  ;;  %p3486_p9 = scmp.ne.s32.totalorder %s3459_s20, 0 }
  0x9c   : > { %2420 = dma.done.wait (%p3486_p9), %s350_s22, 4096  }
  0x9d   : > { %2422 = vsyncadd (%p3486_p9), %s350_s22, 4294963200  ;;  %s1573_s17 = sshll.u32 %s2859_s12, 1  ;;  %v439_v0 = vld [vmem:[%s2875_s26] sm:$0xff]  ;;  %v440_v1 = vld [vmem:[%s2875_s26 + $0x8] sm:$0xff]  ;;  %s2892_s20 = scalar_lea.vmem [#allocation9], %s1569_s23 }
  0x9e   : > { %v441_v2 = vld [vmem:[%s2875_s26 + $0x10] sm:$0xff]  ;;  %v1874_v3 = vpack.c.bf16 %v440_v1, %v439_v0  ;;  %v442_v4 = vld [vmem:[%s2875_s26 + $0x18] sm:$0xff]  ;;  %v2887_v6 = vld [vmem:[%s2865_s18] sm:$0xff]  ;;  %s3487_s21 = sld [smem:[#allocation22_spill]]  ;;  %s3442_s10 = sand.u32 1, %s2437_s25  }
  0x9f   : > { %v1878_v5 = vpack.c.bf16 %v442_v4, %v441_v2  ;;  %v443_v7 = vld [vmem:[%s2875_s26 + $0x20] sm:$0xff]  ;;  %v444_v8 = vld [vmem:[%s2875_s26 + $0x28] sm:$0xff]  ;;  %1724 = vmatprep.mubr.f32.mxu0 %v2887_v6  ;;  %v457_v12 = vld [vmem:[%s2892_s20 + $0x10] sm:$0xff]  ;;  %s3488_s9 = sld [smem:[#allocation33_spill]]  ;;  %s1571_s27 = sshll.u32 %s3442_s10, 7 }
  0xa0   : > { %1875 = vmatprep.subr.bf16.mxu0 %v1874_v3  ;;  %v1882_v9 = vpack.c.bf16 %v444_v8, %v443_v7  ;;  %v455_v10 = vld [vmem:[%s2892_s20] sm:$0xff]  ;;  %v456_v11 = vld [vmem:[%s2892_s20 + $0x8] sm:$0xff]  ;;  %v458_v13 = vld [vmem:[%s2892_s20 + $0x18] sm:$0xff]  ;;  %s2992_s11 = scalar_lea.vmem [#allocation10], %s1571_s27  ;;  %s3082_s4 = scalar_lea.vmem [#allocation11], %s1568_s24 }
  0xa1   : > { %1877 = vmatpush3.bf16.xpose.msra.mxu0 %v1874_v3  ;;  %v1906_v14 = vpack.c.bf16 %v456_v11, %v455_v10  ;;  %v1910_v15 = vpack.c.bf16 %v458_v13, %v457_v12  ;;  %v445_v16 = vld [vmem:[%s2875_s26 + $0x30] sm:$0xff]  ;;  %v446_v17 = vld [vmem:[%s2875_s26 + $0x38] sm:$0xff]  ;;  %v459_v19 = vld [vmem:[%s2892_s20 + $0x20] sm:$0xff]  ;;  %s3086_s7 = scalar_lea.vmem [#allocation13], %s1573_s17 }
  0xa2   : > { %1879 = vmatprep.subr.bf16.mxu0 %v1878_v5  ;;  %v1886_v18 = vpack.c.bf16 %v446_v17, %v445_v16  ;;  %v460_v20 = vld [vmem:[%s2892_s20 + $0x28] sm:$0xff]  ;;  %v447_v22 = vld [vmem:[%s2875_s26 + $0x40] sm:$0xff]  ;;  %v461_v25 = vld [vmem:[%s2892_s20 + $0x30] sm:$0xff] }
  0xa3   : > { %1907 = vmatprep.subr.bf16.mxu1 %v1906_v14  ;;  %v1914_v21 = vpack.c.bf16 %v460_v20, %v459_v19  ;;  %v448_v23 = vld [vmem:[%s2875_s26 + $0x48] sm:$0xff]  ;;  %v462_v26 = vld [vmem:[%s2892_s20 + $0x38] sm:$0xff]  ;;  %v449_v28 = vld [vmem:[%s2875_s26 + $0x50] sm:$0xff] }
  0xa4   : > { %1909 = vmatpush3.bf16.xpose.msra.mxu1 %v1906_v14  ;;  %v1890_v24 = vpack.c.bf16 %v448_v23, %v447_v22  ;;  %v1918_v27 = vpack.c.bf16 %v462_v26, %v461_v25  ;;  %v450_v29 = vld [vmem:[%s2875_s26 + $0x58] sm:$0xff]  ;;  %v463_v31 = vld [vmem:[%s2892_s20 + $0x40] sm:$0xff]  ;;  %v464_v32 = vld [vmem:[%s2892_s20 + $0x48] sm:$0xff]  ;;  %p418_p1 = scmp.lt.s32.totalorder %s3487_s21, 1  ;;  %p1575_p13 = scmp.ne.s32.totalorder %s3487_s21, 0 }
  0xa5   : > { %1911 = vmatprep.subr.bf16.mxu1 %v1910_v15  ;;  %v1894_v30 = vpack.c.bf16 %v450_v29, %v449_v28  ;;  %v1922_v33 = vpack.c.bf16 %v464_v32, %v463_v31  ;;  %v451_v34 = vld [vmem:[%s2875_s26 + $0x60] sm:$0xff]  ;;  %v452_v35 = vld [vmem:[%s2875_s26 + $0x68] sm:$0xff]  ;;  %v465_v37 = vld [vmem:[%s2892_s20 + $0x50] sm:$0xff]  ;;  %vm852_vm0 = vcmask (!%p1575_p13), 7168  }
  0xa6   : > { %v1898_v36 = vpack.c.bf16 %v452_v35, %v451_v34  ;;  %v466_v38 = vld [vmem:[%s2892_s20 + $0x58] sm:$0xff]  ;;  %v453_v40 = vld [vmem:[%s2875_s26 + $0x70] sm:$0xff]  ;;  %v467_v43 = vld [vmem:[%s2892_s20 + $0x60] sm:$0xff]  ;;  %s419_s30 = scalar_select %p418_p1, %s3487_s21, 1 }
  0xa7   : > { %v1926_v39 = vpack.c.bf16 %v466_v38, %v465_v37  ;;  %v454_v41 = vld [vmem:[%s2875_s26 + $0x78] sm:$0xff]  ;;  %v468_v44 = vld [vmem:[%s2892_s20 + $0x68] sm:$0xff]  ;;  %v469_v46 = vld [vmem:[%s2892_s20 + $0x70] sm:$0xff] }
  0xa8   : > { %v1902_v42 = vpack.c.bf16 %v454_v41, %v453_v40  ;;  %v1930_v45 = vpack.c.bf16 %v468_v44, %v467_v43  ;;  %v470_v47 = vld [vmem:[%s2892_s20 + $0x78] sm:$0xff]  ;;  %v2921_v49 = vld [vmem:[%s2865_s18 + $0x8] sm:$0xff]  ;;  %v2924_v50 = vld [vmem:[%s2865_s18 + $0x10] sm:$0xff]  ;;  %s420_s13 = scalar_lea.vmem %s3488_s9, %s419_s30 }
  0xa9   : > { %1881 = vmatpush3.bf16.xpose.msra.mxu0 %v1878_v5  ;;  %v1934_v48 = vpack.c.bf16 %v470_v47, %v469_v46  ;;  %v2929_v51 = vld [vmem:[%s2865_s18 + $0x18] sm:$0xff]  ;;  %v2932_v52 = vld [vmem:[%s2865_s18 + $0x20] sm:$0xff]  ;;  %v2937_v53 = vld [vmem:[%s2865_s18 + $0x28] sm:$0xff] }
  0xaa   : > { %1883 = vmatprep.subr.bf16.mxu0 %v1882_v9  ;;  %v2940_v54 = vld [vmem:[%s2865_s18 + $0x30] sm:$0xff]  ;;  %v2945_v55 = vld [vmem:[%s2865_s18 + $0x38] sm:$0xff]  ;;  %v2948_v56 = vld [vmem:[%s2865_s18 + $0x40] sm:$0xff] }
  0xab   : > { %v2953_v57 = vld [vmem:[%s2865_s18 + $0x48] sm:$0xff]  ;;  %v2956_v58 = vld [vmem:[%s2865_s18 + $0x50] sm:$0xff]  ;;  %v2961_v59 = vld [vmem:[%s2865_s18 + $0x58] sm:$0xff] }
  0xac   : > { %1913 = vmatpush3.bf16.xpose.msra.mxu1 %v1910_v15  ;;  %v2964_v60 = vld [vmem:[%s2865_s18 + $0x60] sm:$0xff]  ;;  %v2969_v61 = vld [vmem:[%s2865_s18 + $0x68] sm:$0xff]  ;;  %v2972_v62 = vld [vmem:[%s2865_s18 + $0x70] sm:$0xff] }
  0xad   : > { %1915 = vmatprep.subr.bf16.mxu1 %v1914_v21  ;;  %v2977_v63 = vld [vmem:[%s2865_s18 + $0x78] sm:$0xff]  ;;  %v2986_v0 = vld [vmem:[%s420_s13] ss:$0 sm:$0xff] }
  0xb1   : > { %1885 = vmatpush3.bf16.xpose.msra.mxu0 %v1882_v9 }
  0xb2   : > { %1887 = vmatprep.subr.bf16.mxu0 %v1886_v18 }
  0xb4   : > { %1917 = vmatpush3.bf16.xpose.msra.mxu1 %v1914_v21 }
  0xb5   : > { %1919 = vmatprep.subr.bf16.mxu1 %v1918_v27 }
  0xb9   : > { %1889 = vmatpush3.bf16.xpose.msra.mxu0 %v1886_v18 }
  0xba   : > { %1891 = vmatprep.subr.bf16.mxu0 %v1890_v24 }
  0xbc   : > { %1921 = vmatpush3.bf16.xpose.msra.mxu1 %v1918_v27 }
  0xbd   : > { %1923 = vmatprep.subr.bf16.mxu1 %v1922_v33 }
  0xc1   : > { %1893 = vmatpush3.bf16.xpose.msra.mxu0 %v1890_v24 }
  0xc2   : > { %1895 = vmatprep.subr.bf16.mxu0 %v1894_v30 }
  0xc4   : > { %1925 = vmatpush3.bf16.xpose.msra.mxu1 %v1922_v33 }
  0xc5   : > { %1927 = vmatprep.subr.bf16.mxu1 %v1926_v39 }
  0xc9   : > { %1897 = vmatpush3.bf16.xpose.msra.mxu0 %v1894_v30 }
  0xca   : > { %1899 = vmatprep.subr.bf16.mxu0 %v1898_v36 }
  0xcc   : > { %1929 = vmatpush3.bf16.xpose.msra.mxu1 %v1926_v39 }
  0xcd   : > { %1931 = vmatprep.subr.bf16.mxu1 %v1930_v45 }
  0xd1   : > { %1901 = vmatpush3.bf16.xpose.msra.mxu0 %v1898_v36 }
  0xd2   : > { %1903 = vmatprep.subr.bf16.mxu0 %v1902_v42 }
  0xd4   : > { %1933 = vmatpush3.bf16.xpose.msra.mxu1 %v1930_v45 }
  0xd5   : > { %1935 = vmatprep.subr.bf16.mxu1 %v1934_v48 }
  0xd9   : > { %1905 = vmatpush3.bf16.xpose.msra.mxu0 %v1902_v42 }
  0xdc   : > { %1937 = vmatpush3.bf16.xpose.msra.mxu1 %v1934_v48 }
  0xe0   : > { %1725 = vmatmul.mubr.f32.vlgmr.msra.gmra.mrb[0].mxu0 %v2921_v49 }
  0xe1   : > { %1727 = vmatprep.mubr.f32.mxu0 %v2924_v50 }
  0xe4   : > { %1728 = vmatmul.mubr.f32.gmra.mrb[2].mxu0 %v2929_v51 }
  0xe5   : > { %1730 = vmatprep.mubr.f32.mxu0 %v2932_v52 }
  0xe8   : > { %1731 = vmatmul.mubr.f32.gmra.mrb[4].mxu0 %v2937_v53 }
  0xe9   : > { %1733 = vmatprep.mubr.f32.mxu0 %v2940_v54 }
  0xec   : > { %1734 = vmatmul.mubr.f32.gmra.mrb[6].mxu0 %v2945_v55 }
  0xed   : > { %1736 = vmatprep.mubr.f32.mxu0 %v2948_v56 }
  0xf0   : > { %1737 = vmatmul.mubr.f32.gmra.mrb[8].mxu0 %v2953_v57 }
  0xf1   : > { %1739 = vmatprep.mubr.f32.mxu0 %v2956_v58 }
  0xf4   : > { %1740 = vmatmul.mubr.f32.gmra.mrb[10].mxu0 %v2961_v59 }
  0xf5   : > { %1742 = vmatprep.mubr.f32.mxu0 %v2964_v60 }
  0xf8   : > { %1743 = vmatmul.mubr.f32.gmra.mrb[12].mxu0 %v2969_v61 }
  0xf9   : > { %1745 = vmatprep.mubr.f32.mxu0 %v2972_v62 }
  0xfc   : > { %1746 = vmatmul.mubr.f32.gmra.mrb[14].mxu0 %v2977_v63 }
 0x1b3   : > { %v1726_v1 = vpop.f32.mrb[0].mxu0 }
 0x1b4   : > { %v550_v2 = vadd.f32 %v1726_v1, %v2986_v0  ;;  %v544_v3 = vpop.f32.mrb[1].mxu0 }
 0x1b5   : > { %v545_v4 = vadd.f32 %v2986_v0, %v544_v3 }
 0x1b6   : > { %v624_v5 = vmax.f32 %v550_v2, 0.0 }
 0x1b7   : > { %v623_v7 = vmax.f32 %v545_v4, 0.0  ;;  %v1729_v8 = vpop.f32.mrb[2].mxu0 }
 0x1b8   : > { %640 = vst [vmem:[%s2992_s11 + $0x8] sm:$0xff] %v624_v5  ;;  %v560_v9 = vadd.f32 %v1729_v8, %v2986_v0  ;;  %802 = vadd.xlane.f32.xlu0 %v624_v5  ;;  %v554_v10 = vpop.f32.mrb[3].mxu0 }
 0x1b9   : > { %639 = vst [vmem:[%s2992_s11] sm:$0xff] %v623_v7  ;;  %v555_v11 = vadd.f32 %v2986_v0, %v554_v10  ;;  %1780 = vmatprep.mubr.f32.mxu1 %v623_v7 }
 0x1ba   : > { %v626_v12 = vmax.f32 %v560_v9, 0.0  ;;  %1781 = vmatmul.mubr.f32.vlgmr.msra.gmra.mrb[0].mxu1 %v624_v5 }
 0x1bb   : > { %v625_v13 = vmax.f32 %v555_v11, 0.0  ;;  %v1732_v14 = vpop.f32.mrb[4].mxu0 }
 0x1bc   : > { %642 = vst [vmem:[%s2992_s11 + $0x18] sm:$0xff] %v626_v12  ;;  %v570_v15 = vadd.f32 %v1732_v14, %v2986_v0  ;;  %806 = vadd.xlane.f32.xlu1 %v626_v12  ;;  %v564_v16 = vpop.f32.mrb[5].mxu0  ;;  %800 = vadd.xlane.f32.xlu0 %v623_v7 }
 0x1bd   : > { %641 = vst [vmem:[%s2992_s11 + $0x10] sm:$0xff] %v625_v13  ;;  %v565_v17 = vadd.f32 %v2986_v0, %v564_v16  ;;  %1783 = vmatprep.mubr.f32.mxu1 %v625_v13 }
 0x1be   : > { %v628_v18 = vmax.f32 %v570_v15, 0.0  ;;  %1784 = vmatmul.mubr.f32.gmra.mrb[2].mxu1 %v626_v12 }
 0x1bf   : > { %v627_v19 = vmax.f32 %v565_v17, 0.0  ;;  %v1735_v20 = vpop.f32.mrb[6].mxu0 }
 0x1c0   : > { %644 = vst [vmem:[%s2992_s11 + $0x28] sm:$0xff] %v628_v18  ;;  %v580_v21 = vadd.f32 %v1735_v20, %v2986_v0  ;;  %v574_v22 = vpop.f32.mrb[7].mxu0  ;;  %804 = vadd.xlane.f32.xlu1 %v625_v13 }
 0x1c1   : > { %643 = vst [vmem:[%s2992_s11 + $0x20] sm:$0xff] %v627_v19  ;;  %v575_v23 = vadd.f32 %v2986_v0, %v574_v22  ;;  %808 = vadd.xlane.f32.xlu0 %v627_v19  ;;  %1786 = vmatprep.mubr.f32.mxu1 %v627_v19 }
 0x1c2   : > { %v630_v24 = vmax.f32 %v580_v21, 0.0  ;;  %1787 = vmatmul.mubr.f32.gmra.mrb[4].mxu1 %v628_v18 }
 0x1c3   : > { %v629_v25 = vmax.f32 %v575_v23, 0.0  ;;  %v1738_v26 = vpop.f32.mrb[8].mxu0 }
 0x1c4   : > { %646 = vst [vmem:[%s2992_s11 + $0x38] sm:$0xff] %v630_v24  ;;  %v590_v27 = vadd.f32 %v1738_v26, %v2986_v0  ;;  %v584_v28 = vpop.f32.mrb[9].mxu0  ;;  %810 = vadd.xlane.f32.xlu1 %v628_v18 }
 0x1c5   : > { %645 = vst [vmem:[%s2992_s11 + $0x30] sm:$0xff] %v629_v25  ;;  %v585_v29 = vadd.f32 %v2986_v0, %v584_v28  ;;  %812 = vadd.xlane.f32.xlu0 %v629_v25  ;;  %1789 = vmatprep.mubr.f32.mxu1 %v629_v25 }
 0x1c6   : > { %v632_v30 = vmax.f32 %v590_v27, 0.0  ;;  %1790 = vmatmul.mubr.f32.gmra.mrb[6].mxu1 %v630_v24 }
 0x1c7   : > { %v631_v31 = vmax.f32 %v585_v29, 0.0  ;;  %v1741_v32 = vpop.f32.mrb[10].mxu0 }
 0x1c8   : > { %648 = vst [vmem:[%s2992_s11 + $0x48] sm:$0xff] %v632_v30  ;;  %v600_v33 = vadd.f32 %v1741_v32, %v2986_v0  ;;  %v594_v34 = vpop.f32.mrb[11].mxu0  ;;  %814 = vadd.xlane.f32.xlu1 %v630_v24 }
 0x1c9   : > { %647 = vst [vmem:[%s2992_s11 + $0x40] sm:$0xff] %v631_v31  ;;  %v595_v35 = vadd.f32 %v2986_v0, %v594_v34  ;;  %816 = vadd.xlane.f32.xlu0 %v631_v31  ;;  %1792 = vmatprep.mubr.f32.mxu1 %v631_v31 }
 0x1ca   : > { %v634_v36 = vmax.f32 %v600_v33, 0.0  ;;  %1793 = vmatmul.mubr.f32.gmra.mrb[8].mxu1 %v632_v30 }
 0x1cb   : > { %v633_v37 = vmax.f32 %v595_v35, 0.0  ;;  %v1744_v38 = vpop.f32.mrb[12].mxu0 }
 0x1cc   : > { %650 = vst [vmem:[%s2992_s11 + $0x58] sm:$0xff] %v634_v36  ;;  %v610_v39 = vadd.f32 %v1744_v38, %v2986_v0  ;;  %v604_v40 = vpop.f32.mrb[13].mxu0  ;;  %818 = vadd.xlane.f32.xlu1 %v632_v30 }
 0x1cd   : > { %649 = vst [vmem:[%s2992_s11 + $0x50] sm:$0xff] %v633_v37  ;;  %v605_v41 = vadd.f32 %v2986_v0, %v604_v40  ;;  %820 = vadd.xlane.f32.xlu0 %v633_v37  ;;  %1795 = vmatprep.mubr.f32.mxu1 %v633_v37 }
 0x1ce   : > { %v636_v42 = vmax.f32 %v610_v39, 0.0  ;;  %1796 = vmatmul.mubr.f32.gmra.mrb[10].mxu1 %v634_v36 }
 0x1cf   : > { %v635_v43 = vmax.f32 %v605_v41, 0.0  ;;  %v1747_v44 = vpop.f32.mrb[14].mxu0 }
 0x1d0   : > { %652 = vst [vmem:[%s2992_s11 + $0x68] sm:$0xff] %v636_v42  ;;  %v620_v45 = vadd.f32 %v1747_v44, %v2986_v0  ;;  %v614_v46 = vpop.f32.mrb[15].mxu0  ;;  %822 = vadd.xlane.f32.xlu1 %v634_v36 }
 0x1d1   : > { %651 = vst [vmem:[%s2992_s11 + $0x60] sm:$0xff] %v635_v43  ;;  %v615_v47 = vadd.f32 %v2986_v0, %v614_v46  ;;  %824 = vadd.xlane.f32.xlu0 %v635_v43  ;;  %1798 = vmatprep.mubr.f32.mxu1 %v635_v43 }
 0x1d2   : > { %v638_v48 = vmax.f32 %v620_v45, 0.0  ;;  %1799 = vmatmul.mubr.f32.gmra.mrb[12].mxu1 %v636_v42 }
 0x1d3   : > { %v637_v1 = vmax.f32 %v615_v47, 0.0 }
 0x1d4   : > { %654 = vst [vmem:[%s2992_s11 + $0x78] sm:$0xff] %v638_v48  ;;  %826 = vadd.xlane.f32.xlu1 %v636_v42 }
 0x1d5   : > { %653 = vst [vmem:[%s2992_s11 + $0x70] sm:$0xff] %v637_v1  ;;  %828 = vadd.xlane.f32.xlu0 %v637_v1  ;;  %1801 = vmatprep.mubr.f32.mxu1 %v637_v1 }
 0x1d6   : > { %1802 = vmatmul.mubr.f32.gmra.mrb[14].mxu1 %v638_v48 }
 0x1d8   : > { %830 = vadd.xlane.f32.xlu1 %v638_v48 }
 0x245   : > { %v3024_v2 = vpop.xlane.xlu0 %802 }
 0x246   : > { %854 = vst.msk [vmem:[#allocation3 + $0x8] sm:$0xff] (!%p1575_p13), %vm852_vm0, %v3024_v2 }
 0x249   : > { %v3026_v3 = vpop.xlane.xlu1 %806  ;;  %v3028_v4 = vpop.xlane.xlu0 %800 }
 0x24a   : > { %853 = vst.msk [vmem:[#allocation3] sm:$0xff] (!%p1575_p13), %vm852_vm0, %v3028_v4  ;;  %856 = vst.msk [vmem:[#allocation3 + $0x18] sm:$0xff] (!%p1575_p13), %vm852_vm0, %v3026_v3 }
 0x24d   : > { %v3030_v5 = vpop.xlane.xlu1 %804 }
 0x24e   : > { %v3032_v0 = vpop.xlane.xlu0 %808  ;;  %855 = vst.msk [vmem:[#allocation3 + $0x10] sm:$0xff] (!%p1575_p13), %vm852_vm0, %v3030_v5 }
 0x24f   : > { %857 = vst.msk [vmem:[#allocation3 + $0x20] sm:$0xff] (!%p1575_p13), %vm852_vm0, %v3032_v0 }
 0x251   : > { %v3034_v7 = vpop.xlane.xlu1 %810 }
 0x252   : > { %v3036_v8 = vpop.xlane.xlu0 %812  ;;  %858 = vst.msk [vmem:[#allocation3 + $0x28] sm:$0xff] (!%p1575_p13), %vm852_vm0, %v3034_v7 }
 0x253   : > { %859 = vst.msk [vmem:[#allocation3 + $0x30] sm:$0xff] (!%p1575_p13), %vm852_vm0, %v3036_v8 }
 0x255   : > { %v3038_v9 = vpop.xlane.xlu1 %814 }
 0x256   : > { %v3040_v10 = vpop.xlane.xlu0 %816  ;;  %860 = vst.msk [vmem:[#allocation3 + $0x38] sm:$0xff] (!%p1575_p13), %vm852_vm0, %v3038_v9 }
 0x257   : > { %861 = vst.msk [vmem:[#allocation3 + $0x40] sm:$0xff] (!%p1575_p13), %vm852_vm0, %v3040_v10 }
 0x259   : > { %v3042_v11 = vpop.xlane.xlu1 %818 }
 0x25a   : > { %v3044_v12 = vpop.xlane.xlu0 %820  ;;  %862 = vst.msk [vmem:[#allocation3 + $0x48] sm:$0xff] (!%p1575_p13), %vm852_vm0, %v3042_v11 }
 0x25b   : > { %863 = vst.msk [vmem:[#allocation3 + $0x50] sm:$0xff] (!%p1575_p13), %vm852_vm0, %v3044_v12 }
 0x25d   : > { %v3046_v13 = vpop.xlane.xlu1 %822 }
 0x25e   : > { %v3048_v14 = vpop.xlane.xlu0 %824  ;;  %864 = vst.msk [vmem:[#allocation3 + $0x58] sm:$0xff] (!%p1575_p13), %vm852_vm0, %v3046_v13 }
 0x25f   : > { %865 = vst.msk [vmem:[#allocation3 + $0x60] sm:$0xff] (!%p1575_p13), %vm852_vm0, %v3048_v14 }
 0x261   : > { %v3050_v15 = vpop.xlane.xlu1 %826 }
 0x262   : > { %v3052_v16 = vpop.xlane.xlu0 %828  ;;  %866 = vst.msk [vmem:[#allocation3 + $0x68] sm:$0xff] (!%p1575_p13), %vm852_vm0, %v3050_v15 }
 0x263   : > { %867 = vst.msk [vmem:[#allocation3 + $0x70] sm:$0xff] (!%p1575_p13), %vm852_vm0, %v3052_v16 }
 0x265   : > { %v3054_v17 = vpop.xlane.xlu1 %830 }
 0x266   : > { %868 = vst.msk [vmem:[#allocation3 + $0x78] sm:$0xff] (!%p1575_p13), %vm852_vm0, %v3054_v17 }
 0x28d   : > { %v1782_v18 = vpop.f32.mrb[0].mxu1 }
 0x28e   : > { %v721_v19 = vpop.f32.mrb[1].mxu1  ;;  %837 = vst [vmem:[#allocation2 + $0x8] sm:$0xff] (!%p1575_p13), %v1782_v18 }
 0x28f   : > { %836 = vst [vmem:[#allocation2] sm:$0xff] (!%p1575_p13), %v721_v19 }
 0x291   : > { %v3056_v20 = vpop.f32.mrb[2].mxu1 }
 0x292   : > { %v731_v21 = vpop.f32.mrb[3].mxu1  ;;  %839 = vst [vmem:[#allocation2 + $0x18] sm:$0xff] (!%p1575_p13), %v3056_v20 }
 0x293   : > { %838 = vst [vmem:[#allocation2 + $0x10] sm:$0xff] (!%p1575_p13), %v731_v21 }
 0x295   : > { %v3058_v22 = vpop.f32.mrb[4].mxu1 }
 0x296   : > { %v741_v23 = vpop.f32.mrb[5].mxu1  ;;  %841 = vst [vmem:[#allocation2 + $0x28] sm:$0xff] (!%p1575_p13), %v3058_v22 }
 0x297   : > { %840 = vst [vmem:[#allocation2 + $0x20] sm:$0xff] (!%p1575_p13), %v741_v23 }
 0x299   : > { %v3060_v24 = vpop.f32.mrb[6].mxu1 }
 0x29a   : > { %v3062_v25 = vpop.f32.mrb[7].mxu1  ;;  %843 = vst [vmem:[#allocation2 + $0x38] sm:$0xff] (!%p1575_p13), %v3060_v24 }
 0x29b   : > { %842 = vst [vmem:[#allocation2 + $0x30] sm:$0xff] (!%p1575_p13), %v3062_v25 }
 0x29d   : > { %v3064_v26 = vpop.f32.mrb[8].mxu1 }
 0x29e   : > { %v3066_v27 = vpop.f32.mrb[9].mxu1  ;;  %845 = vst [vmem:[#allocation2 + $0x48] sm:$0xff] (!%p1575_p13), %v3064_v26 }
 0x29f   : > { %844 = vst [vmem:[#allocation2 + $0x40] sm:$0xff] (!%p1575_p13), %v3066_v27 }
 0x2a1   : > { %v3068_v28 = vpop.f32.mrb[10].mxu1 }
 0x2a2   : > { %v3070_v29 = vpop.f32.mrb[11].mxu1  ;;  %847 = vst [vmem:[#allocation2 + $0x58] sm:$0xff] (!%p1575_p13), %v3068_v28 }
 0x2a3   : > { %846 = vst [vmem:[#allocation2 + $0x50] sm:$0xff] (!%p1575_p13), %v3070_v29 }
 0x2a4   : > { %835 = sbr.rel (%p1575_p13) target bundleno = 684 (0x2ac), region = 56 }
 0x2a5   : > { %v3072_v30 = vpop.f32.mrb[12].mxu1 }
 0x2a6   : > { %v3074_v31 = vpop.f32.mrb[13].mxu1  ;;  %849 = vst [vmem:[#allocation2 + $0x68] sm:$0xff] (!%p1575_p13), %v3072_v30 }
 0x2a7   : > { %848 = vst [vmem:[#allocation2 + $0x60] sm:$0xff] (!%p1575_p13), %v3074_v31 }
 0x2a9   : > { %v3076_v32 = vpop.f32.mrb[14].mxu1 }
 0x2aa   : > { %v3078_v33 = vpop.f32.mrb[15].mxu1  ;;  %851 = vst [vmem:[#allocation2 + $0x78] sm:$0xff] (!%p1575_p13), %v3076_v32 }
 0x2ab   : > { %850 = vst [vmem:[#allocation2 + $0x70] sm:$0xff] %v3078_v33 }
 0x2ac PF: > { %s3489_s12 = sld [smem:[#allocation22_spill]] }
 0x2b2   : > { %p1576_p6 = scmp.eq.s32.totalorder %s3489_s12, 0 }
 0x2b3   : > { %v873_v34 = vld [vmem:[#allocation2] sm:$0xff] (!%p1576_p6)  ;;  %v874_v35 = vld [vmem:[#allocation2 + $0x8] sm:$0xff] (!%p1576_p6)  ;;  %v875_v36 = vld [vmem:[#allocation2 + $0x10] sm:$0xff] (!%p1576_p6)  ;;  %vm953_vm1 = vcmask (!%p1576_p6), 7168  }
 0x2b4   : > { %872 = sbr.rel (%p1576_p6) target bundleno = 710 (0x2c6), region = 60  ;;  %v889_v37 = vadd.f32 (!%p1576_p6), %v873_v34, %v721_v19  ;;  %v890_v38 = vadd.f32 (!%p1576_p6), %v1782_v18, %v874_v35  ;;  %v891_v39 = vadd.f32 (!%p1576_p6), %v875_v36, %v731_v21  ;;  %v876_v40 = vld [vmem:[#allocation2 + $0x18] sm:$0xff] (!%p1576_p6)  ;;  %v877_v41 = vld [vmem:[#allocation2 + $0x20] sm:$0xff] (!%p1576_p6)  ;;  %v878_v42 = vld [vmem:[#allocation2 + $0x28] sm:$0xff] (!%p1576_p6) }
 0x2b5   : > { %v892_v43 = vadd.f32 (!%p1576_p6), %v3056_v20, %v876_v40  ;;  %v893_v44 = vadd.f32 (!%p1576_p6), %v877_v41, %v741_v23  ;;  %v894_v45 = vadd.f32 (!%p1576_p6), %v3058_v22, %v878_v42  ;;  %v879_v46 = vld [vmem:[#allocation2 + $0x30] sm:$0xff] (!%p1576_p6)  ;;  %v880_v47 = vld [vmem:[#allocation2 + $0x38] sm:$0xff] (!%p1576_p6)  ;;  %v881_v48 = vld [vmem:[#allocation2 + $0x40] sm:$0xff] (!%p1576_p6) }
 0x2b6   : > { %905 = vst [vmem:[#allocation2] sm:$0xff] (!%p1576_p6), %v889_v37  ;;  %906 = vst [vmem:[#allocation2 + $0x8] sm:$0xff] (!%p1576_p6), %v890_v38  ;;  %v895_v1 = vadd.f32 (!%p1576_p6), %v879_v46, %v3062_v25  ;;  %v896_v19 = vadd.f32 (!%p1576_p6), %v3060_v24, %v880_v47  ;;  %v897_v18 = vadd.f32 (!%p1576_p6), %v881_v48, %v3066_v27  ;;  %v882_v21 = vld [vmem:[#allocation2 + $0x48] sm:$0xff] (!%p1576_p6)  ;;  %v883_v34 = vld [vmem:[#allocation2 + $0x50] sm:$0xff] (!%p1576_p6) }
 0x2b7   : > { %907 = vst [vmem:[#allocation2 + $0x10] sm:$0xff] (!%p1576_p6), %v891_v39  ;;  %v884_v35 = vld [vmem:[#allocation2 + $0x58] sm:$0xff] (!%p1576_p6)  ;;  %908 = vst [vmem:[#allocation2 + $0x18] sm:$0xff] (!%p1576_p6), %v892_v43  ;;  %v898_v20 = vadd.f32 (!%p1576_p6), %v3064_v26, %v882_v21  ;;  %v899_v22 = vadd.f32 (!%p1576_p6), %v883_v34, %v3070_v29  ;;  %v885_v36 = vld [vmem:[#allocation2 + $0x60] sm:$0xff] (!%p1576_p6) }
 0x2b8   : > { %909 = vst [vmem:[#allocation2 + $0x20] sm:$0xff] (!%p1576_p6), %v893_v44  ;;  %910 = vst [vmem:[#allocation2 + $0x28] sm:$0xff] (!%p1576_p6), %v894_v45  ;;  %v900_v23 = vadd.f32 (!%p1576_p6), %v3068_v28, %v884_v35  ;;  %v886_v37 = vld [vmem:[#allocation2 + $0x68] sm:$0xff] (!%p1576_p6)  ;;  %v887_v38 = vld [vmem:[#allocation2 + $0x70] sm:$0xff] (!%p1576_p6)  ;;  %v901_v24 = vadd.f32 (!%p1576_p6), %v885_v36, %v3074_v31 }
 0x2b9   : > { %911 = vst [vmem:[#allocation2 + $0x30] sm:$0xff] (!%p1576_p6), %v895_v1  ;;  %912 = vst [vmem:[#allocation2 + $0x38] sm:$0xff] (!%p1576_p6), %v896_v19  ;;  %v902_v25 = vadd.f32 (!%p1576_p6), %v3072_v30, %v886_v37  ;;  %v903_v27 = vadd.f32 (!%p1576_p6), %v887_v38, %v3078_v33  ;;  %v888_v39 = vld [vmem:[#allocation2 + $0x78] sm:$0xff] (!%p1576_p6)  ;;  %v921_v40 = vld [vmem:[#allocation3] sm:$0xff] (!%p1576_p6) }
 0x2ba   : > { %913 = vst [vmem:[#allocation2 + $0x40] sm:$0xff] (!%p1576_p6), %v897_v18  ;;  %v922_v26 = vld [vmem:[#allocation3 + $0x8] sm:$0xff] (!%p1576_p6)  ;;  %914 = vst [vmem:[#allocation2 + $0x48] sm:$0xff] (!%p1576_p6), %v898_v20  ;;  %v904_v28 = vadd.f32 (!%p1576_p6), %v3076_v32, %v888_v39  ;;  %v937_v29 = vadd.f32 (!%p1576_p6), %v921_v40, %v3028_v4  ;;  %v923_v42 = vld [vmem:[#allocation3 + $0x10] sm:$0xff] (!%p1576_p6) }
 0x2bb   : > { %915 = vst [vmem:[#allocation2 + $0x50] sm:$0xff] %v899_v22  ;;  %916 = vst [vmem:[#allocation2 + $0x58] sm:$0xff] %v900_v23  ;;  %v938_v41 = vadd.f32 %v922_v26, %v3024_v2  ;;  %v924_v43 = vld [vmem:[#allocation3 + $0x18] sm:$0xff]  ;;  %v925_v31 = vld [vmem:[#allocation3 + $0x20] sm:$0xff]  ;;  %v939_v30 = vadd.f32 %v923_v42, %v3030_v5 }
 0x2bc   : > { %917 = vst [vmem:[#allocation2 + $0x60] sm:$0xff] %v901_v24  ;;  %918 = vst [vmem:[#allocation2 + $0x68] sm:$0xff] %v902_v25  ;;  %v940_v33 = vadd.f32 %v924_v43, %v3026_v3  ;;  %v941_v44 = vadd.f32 %v925_v31, %v3032_v0  ;;  %v926_v45 = vld [vmem:[#allocation3 + $0x28] sm:$0xff]  ;;  %v927_v46 = vld [vmem:[#allocation3 + $0x30] sm:$0xff] }
 0x2bd   : > { %919 = vst [vmem:[#allocation2 + $0x70] sm:$0xff] %v903_v27  ;;  %v928_v47 = vld [vmem:[#allocation3 + $0x38] sm:$0xff]  ;;  %920 = vst [vmem:[#allocation2 + $0x78] sm:$0xff] %v904_v28  ;;  %v942_v2 = vadd.f32 %v926_v45, %v3034_v7  ;;  %v943_v4 = vadd.f32 %v927_v46, %v3036_v8  ;;  %v929_v48 = vld [vmem:[#allocation3 + $0x40] sm:$0xff] }
 0x2be   : > { %954 = vst.msk [vmem:[#allocation3] sm:$0xff] %vm953_vm1, %v937_v29  ;;  %955 = vst.msk [vmem:[#allocation3 + $0x8] sm:$0xff] %vm953_vm1, %v938_v41  ;;  %v944_v32 = vadd.f32 %v928_v47, %v3038_v9  ;;  %v930_v5 = vld [vmem:[#allocation3 + $0x48] sm:$0xff]  ;;  %v931_v1 = vld [vmem:[#allocation3 + $0x50] sm:$0xff]  ;;  %v945_v3 = vadd.f32 %v929_v48, %v3040_v10 }
 0x2bf   : > { %956 = vst.msk [vmem:[#allocation3 + $0x10] sm:$0xff] %vm953_vm1, %v939_v30  ;;  %957 = vst.msk [vmem:[#allocation3 + $0x18] sm:$0xff] %vm953_vm1, %v940_v33  ;;  %v946_v0 = vadd.f32 %v930_v5, %v3042_v11  ;;  %v947_v19 = vadd.f32 %v931_v1, %v3044_v12  ;;  %v932_v7 = vld [vmem:[#allocation3 + $0x58] sm:$0xff]  ;;  %v933_v18 = vld [vmem:[#allocation3 + $0x60] sm:$0xff] }
 0x2c0   : > { %958 = vst.msk [vmem:[#allocation3 + $0x20] sm:$0xff] %vm953_vm1, %v941_v44  ;;  %v934_v8 = vld [vmem:[#allocation3 + $0x68] sm:$0xff]  ;;  %959 = vst.msk [vmem:[#allocation3 + $0x28] sm:$0xff] %vm953_vm1, %v942_v2  ;;  %v948_v9 = vadd.f32 %v932_v7, %v3046_v13  ;;  %v949_v21 = vadd.f32 %v933_v18, %v3048_v14  ;;  %v935_v10 = vld [vmem:[#allocation3 + $0x70] sm:$0xff] }
 0x2c1   : > { %960 = vst.msk [vmem:[#allocation3 + $0x30] sm:$0xff] %vm953_vm1, %v943_v4  ;;  %961 = vst.msk [vmem:[#allocation3 + $0x38] sm:$0xff] %vm953_vm1, %v944_v32  ;;  %v950_v34 = vadd.f32 %v934_v8, %v3050_v15  ;;  %v936_v35 = vld [vmem:[#allocation3 + $0x78] sm:$0xff]  ;;  %v951_v11 = vadd.f32 %v935_v10, %v3052_v16 }
 0x2c2   : > { %962 = vst.msk [vmem:[#allocation3 + $0x40] sm:$0xff] %vm953_vm1, %v945_v3  ;;  %963 = vst.msk [vmem:[#allocation3 + $0x48] sm:$0xff] %vm953_vm1, %v946_v0  ;;  %v952_v12 = vadd.f32 %v936_v35, %v3054_v17 }
 0x2c3   : > { %964 = vst.msk [vmem:[#allocation3 + $0x50] sm:$0xff] %vm953_vm1, %v947_v19  ;;  %965 = vst.msk [vmem:[#allocation3 + $0x58] sm:$0xff] %vm953_vm1, %v948_v9 }
 0x2c4   : > { %966 = vst.msk [vmem:[#allocation3 + $0x60] sm:$0xff] %vm953_vm1, %v949_v21  ;;  %967 = vst.msk [vmem:[#allocation3 + $0x68] sm:$0xff] %vm953_vm1, %v950_v34 }
 0x2c5   : > { %968 = vst.msk [vmem:[#allocation3 + $0x70] sm:$0xff] %vm953_vm1, %v951_v11  ;;  %969 = vst.msk [vmem:[#allocation3 + $0x78] sm:$0xff] %vm953_vm1, %v952_v12 }
 0x2c6 PF: > { %s3490_s24 = sld [smem:[#allocation22_spill]] }
 0x2cc   : > { %p1577_p8 = scmp.ne.s32.totalorder %s3490_s24, 1 }
 0x2cd   : > { %v1133_v13 = vld [vmem:[#allocation3] sm:$0xff] (!%p1577_p8)  ;;  %v1134_v14 = vld [vmem:[#allocation3 + $0x8] sm:$0xff] (!%p1577_p8)  ;;  %v2493_v16 = vmov (!%p1577_p8), 0   ;;  %v1135_v22 = vld [vmem:[#allocation3 + $0x10] sm:$0xff] (!%p1577_p8)  ;;  %v2494_v26 = vmov (!%p1577_p8), 0.0|0.0   ;;  %s3491_s23 = sld [smem:[#allocation34_spill]] (!%p1577_p8) }
 0x2ce   : > { %973 = sbr.rel (%p1577_p8) target bundleno = 1130 (0x46a), region = 64  ;;  %v1137_v15 = vld [vmem:[#allocation3 + $0x20] sm:$0xff] (!%p1577_p8)  ;;  %2143 = vset.pattern.permute.xlu0 (!%p1577_p8), %v2493_v16  ;;  %v2144_v17 = vpack.i.bf16 (!%p1577_p8), %v1134_v14, %v1133_v13  ;;  %2154 = vset.pattern.permute.xlu1 (!%p1577_p8), %v2493_v16  ;;  %v1138_v20 = vld [vmem:[#allocation3 + $0x28] sm:$0xff] (!%p1577_p8)  ;;  %v1136_v23 = vld [vmem:[#allocation3 + $0x18] sm:$0xff] (!%p1577_p8)  ;;  %vm2495_vm2 = vmmov (!%p1577_p8), 0  }
 0x2cf   : > { %v2155_v36 = vpack.i.bf16 (!%p1577_p8), %v1138_v20, %v1137_v15  ;;  %v1139_v37 = vld [vmem:[#allocation3 + $0x30] sm:$0xff] (!%p1577_p8)  ;;  %v1140_v38 = vld [vmem:[#allocation3 + $0x38] sm:$0xff] (!%p1577_p8)  ;;  %v2149_v24 = vpack.i.bf16 (!%p1577_p8), %v1136_v23, %v1135_v22  ;;  %v1141_v25 = vld [vmem:[#allocation3 + $0x40] sm:$0xff] (!%p1577_p8)  ;;  %1938 = vmatprep.subr.bf16.mxu0 (!%p1577_p8), %v2494_v26  ;;  %1962 = vmatprep.subr.bf16.mxu1 (!%p1577_p8), %v2494_v26 }
 0x2d0   : > { %2145 = vperm.xlu0 (!%p1577_p8), %2143, %v2144_v17   ;;  %v1142_v27 = vld [vmem:[#allocation3 + $0x48] sm:$0xff] (!%p1577_p8)  ;;  %v2160_v39 = vpack.i.bf16 (!%p1577_p8), %v1140_v38, %v1139_v37  ;;  %v1143_v40 = vld [vmem:[#allocation3 + $0x50] sm:$0xff] (!%p1577_p8)  ;;  %v1144_v28 = vld [vmem:[#allocation3 + $0x58] sm:$0xff] (!%p1577_p8) }
 0x2d1   : > { %2156 = vperm.xlu1 (!%p1577_p8), %2154, %v2155_v36   ;;  %v974_v29 = vld [vmem:[#allocation2] sm:$0xff] (!%p1577_p8)  ;;  %v975_v41 = vld [vmem:[#allocation2 + $0x8] sm:$0xff] (!%p1577_p8)  ;;  %v2165_v42 = vpack.i.bf16 (!%p1577_p8), %v1142_v27, %v1141_v25  ;;  %v976_v31 = vld [vmem:[#allocation2 + $0x10] sm:$0xff] (!%p1577_p8)  ;;  %v2170_v4 = vpack.i.bf16 (!%p1577_p8), %v1144_v28, %v1143_v40 }
 0x2d2   : > { %v977_v30 = vld [vmem:[#allocation2 + $0x18] sm:$0xff] (!%p1577_p8)  ;;  %v1145_v33 = vld [vmem:[#allocation3 + $0x60] sm:$0xff] (!%p1577_p8)  ;;  %v1146_v44 = vld [vmem:[#allocation3 + $0x68] sm:$0xff] (!%p1577_p8) }
 0x2d3   : > { %v3184_v43 = vld [vmem:[%s3491_s23] ss:$0 sm:$0xff] (!%p1577_p8)  ;;  %v1147_v32 = vld [vmem:[#allocation3 + $0x70] sm:$0xff] (!%p1577_p8)  ;;  %v1148_v48 = vld [vmem:[#allocation3 + $0x78] sm:$0xff] (!%p1577_p8)  ;;  %v2175_v3 = vpack.i.bf16 (!%p1577_p8), %v1146_v44, %v1145_v33 }
 0x2d4   : > { %2150 = vperm.xlu0 (!%p1577_p8), %2143, %v2149_v24   ;;  %v997_v45 = vadd.f32 (!%p1577_p8), %v3184_v43, %v974_v29  ;;  %v998_v46 = vadd.f32 (!%p1577_p8), %v3184_v43, %v975_v41  ;;  %v999_v47 = vadd.f32 (!%p1577_p8), %v3184_v43, %v976_v31  ;;  %v1000_v2 = vadd.f32 (!%p1577_p8), %v3184_v43, %v977_v30  ;;  %v978_v21 = vld [vmem:[#allocation2 + $0x20] sm:$0xff] (!%p1577_p8)  ;;  %v979_v34 = vld [vmem:[#allocation2 + $0x28] sm:$0xff] (!%p1577_p8)  ;;  %v980_v12 = vld [vmem:[#allocation2 + $0x30] sm:$0xff] (!%p1577_p8) }
 0x2d5   : > { %2161 = vperm.xlu1 %2154, %v2160_v39   ;;  %v2180_v8 = vpack.i.bf16 %v1148_v48, %v1147_v32  ;;  %v981_v13 = vld [vmem:[#allocation2 + $0x38] sm:$0xff]  ;;  %v1003_v14 = vadd.f32 %v3184_v43, %v980_v12  ;;  %v982_v22 = vld [vmem:[#allocation2 + $0x40] sm:$0xff]  ;;  %v983_v23 = vld [vmem:[#allocation2 + $0x48] sm:$0xff] }
 0x2d6   : > { %1013 = vst [vmem:[%s3082_s4] sm:$0xff] %v997_v45  ;;  %1014 = vst [vmem:[%s3082_s4 + $0x8] sm:$0xff] %v998_v46  ;;  %v1029_v5 = vsub.f32 %v997_v45, %v2887_v6  ;;  %v1030_v1 = vsub.f32 %v998_v46, %v2921_v49  ;;  %v1031_v7 = vsub.f32 %v999_v47, %v2924_v50  ;;  %v984_v27 = vld [vmem:[#allocation2 + $0x50] sm:$0xff]  ;;  %v985_v39 = vld [vmem:[#allocation2 + $0x58] sm:$0xff] }
 0x2d7   : > { %1015 = vst [vmem:[%s3082_s4 + $0x10] sm:$0xff] %v999_v47  ;;  %1016 = vst [vmem:[%s3082_s4 + $0x18] sm:$0xff] %v1000_v2  ;;  %v1032_v18 = vsub.f32 %v1000_v2, %v2929_v51  ;;  %v1001_v6 = vadd.f32 %v3184_v43, %v978_v21  ;;  %v1002_v49 = vadd.f32 %v3184_v43, %v979_v34  ;;  %v986_v31 = vld [vmem:[#allocation2 + $0x60] sm:$0xff]  ;;  %v987_v30 = vld [vmem:[#allocation2 + $0x68] sm:$0xff] }
 0x2d8   : > { %2166 = vperm.xlu0 %2143, %v2165_v42   ;;  %v1045_v0 = vmul.f32 %v1029_v5, %v1029_v5  ;;  %v1046_v19 = vmul.f32 %v1030_v1, %v1030_v1  ;;  %v1047_v10 = vmul.f32 %v1031_v7, %v1031_v7  ;;  %v1004_v15 = vadd.f32 %v3184_v43, %v981_v13  ;;  %v988_v2 = vld [vmem:[#allocation2 + $0x70] sm:$0xff] }
 0x2d9   : > { %2171 = vperm.xlu1 %2154, %v2170_v4   ;;  %v1048_v35 = vmul.f32 %v1032_v18, %v1032_v18  ;;  %1017 = vst [vmem:[%s3082_s4 + $0x20] sm:$0xff] %v1001_v6  ;;  %1018 = vst [vmem:[%s3082_s4 + $0x28] sm:$0xff] %v1002_v49  ;;  %v1033_v51 = vsub.f32 %v1001_v6, %v2932_v52  ;;  %v1034_v11 = vsub.f32 %v1002_v49, %v2937_v53  ;;  %v989_v4 = vld [vmem:[#allocation2 + $0x78] sm:$0xff]  ;;  %v2496_v7 = vmov 0.0  }
 0x2da   : > { %v1939_v9 = vpack.c.bf16 %v1046_v19, %v1045_v0  ;;  %1019 = vst [vmem:[%s3082_s4 + $0x30] sm:$0xff] %v1003_v14  ;;  %1020 = vst [vmem:[%s3082_s4 + $0x38] sm:$0xff] %v1004_v15  ;;  %v1035_v52 = vsub.f32 %v1003_v14, %v2940_v54  ;;  %v1036_v53 = vsub.f32 %v1004_v15, %v2945_v55  ;;  %1836 = vmatprep.mubr.msk.f32.mxu0 %vm2495_vm2, %v2496_v7  ;;  %v2497_v18 = vmov 1.0  }
 0x2db   : > { %v1942_v50 = vpack.c.bf16 %v1048_v35, %v1047_v10  ;;  %v1049_v16 = vmul.f32 %v1033_v51, %v1033_v51  ;;  %v1050_v17 = vmul.f32 %v1034_v11, %v1034_v11  ;;  %v1005_v36 = vadd.f32 %v3184_v43, %v982_v22  ;;  %1871 = vmatprep.mubr.msk.f32.mxu1 %vm2495_vm2, %v2496_v7 }
 0x2dc   : > { %2176 = vperm.xlu0 %2143, %v2175_v3   ;;  %1940 = vmatpush3.bf16.xpose.msra.mxu0 %v1939_v9  ;;  %v1006_v37 = vadd.f32 %v3184_v43, %v983_v23  ;;  %v1051_v38 = vmul.f32 %v1035_v52, %v1035_v52  ;;  %v1052_v24 = vmul.f32 %v1036_v53, %v1036_v53 }
 0x2dd   : > { %2181 = vperm.xlu1 %2154, %v2180_v8   ;;  %1941 = vmatprep.subr.bf16.mxu0 %v2494_v26  ;;  %v1945_v20 = vpack.c.bf16 %v1050_v17, %v1049_v16  ;;  %1021 = vst [vmem:[%s3082_s4 + $0x40] sm:$0xff] %v1005_v36  ;;  %v1037_v54 = vsub.f32 %v1005_v36, %v2948_v56 }
 0x2de   : > { %1022 = vst [vmem:[%s3082_s4 + $0x48] sm:$0xff] %v1006_v37  ;;  %v1948_v25 = vpack.c.bf16 %v1052_v24, %v1051_v38  ;;  %v1038_v55 = vsub.f32 %v1006_v37, %v2953_v57  ;;  %v1007_v40 = vadd.f32 %v3184_v43, %v984_v27  ;;  %v1008_v28 = vadd.f32 %v3184_v43, %v985_v39 }
 0x2df   : > { %v1053_v29 = vmul.f32 %v1037_v54, %v1037_v54  ;;  %v1009_v33 = vadd.f32 %v3184_v43, %v986_v31  ;;  %v1010_v44 = vadd.f32 %v3184_v43, %v987_v30  ;;  %v1011_v32 = vadd.f32 %v3184_v43, %v988_v2 }
 0x2e0   : > { %v1054_v41 = vmul.f32 %v1038_v55, %v1038_v55  ;;  %1023 = vst [vmem:[%s3082_s4 + $0x50] sm:$0xff] %v1007_v40  ;;  %1024 = vst [vmem:[%s3082_s4 + $0x58] sm:$0xff] %v1008_v28  ;;  %v1039_v56 = vsub.f32 %v1007_v40, %v2956_v58  ;;  %v1040_v57 = vsub.f32 %v1008_v28, %v2961_v59 }
 0x2e1   : > { %1025 = vst [vmem:[%s3082_s4 + $0x60] sm:$0xff] %v1009_v33  ;;  %1026 = vst [vmem:[%s3082_s4 + $0x68] sm:$0xff] %v1010_v44  ;;  %v1041_v58 = vsub.f32 %v1009_v33, %v2964_v60  ;;  %v1042_v59 = vsub.f32 %v1010_v44, %v2969_v61  ;;  %v1012_v48 = vadd.f32 %v3184_v43, %v989_v4 }
 0x2e2   : > { %v1951_v42 = vpack.c.bf16 %v1054_v41, %v1053_v29  ;;  %v1055_v45 = vmul.f32 %v1039_v56, %v1039_v56  ;;  %v1056_v46 = vmul.f32 %v1040_v57, %v1040_v57  ;;  %1027 = vst [vmem:[%s3082_s4 + $0x70] sm:$0xff] %v1011_v32  ;;  %v1043_v0 = vsub.f32 %v1011_v32, %v2972_v62 }
 0x2e3   : > { %v1057_v5 = vmul.f32 %v1041_v58, %v1041_v58  ;;  %v1058_v1 = vmul.f32 %v1042_v59, %v1042_v59  ;;  %1028 = vst [vmem:[%s3082_s4 + $0x78] sm:$0xff] %v1012_v48  ;;  %v1044_v60 = vsub.f32 %v1012_v48, %v2977_v63 }
 0x2e4   : > { %1943 = vmatpush3.bf16.xpose.msra.mxu0 %v1942_v50  ;;  %v1954_v47 = vpack.c.bf16 %v1056_v46, %v1055_v45  ;;  %v1059_v61 = vmul.f32 %v1043_v0, %v1043_v0 }
 0x2e5   : > { %1944 = vmatprep.subr.bf16.mxu0 %v2494_v26  ;;  %v1957_v3 = vpack.c.bf16 %v1058_v1, %v1057_v5  ;;  %v1060_v19 = vmul.f32 %v1044_v60, %v1044_v60 }
 0x2e7   : > { %v1960_v43 = vpack.c.bf16 %v1060_v19, %v1059_v61 }
 0x2ec   : > { %1946 = vmatpush3.bf16.xpose.msra.mxu0 %v1945_v20 }
 0x2ed   : > { %1947 = vmatprep.subr.bf16.mxu0 %v2494_v26 }
 0x2f4   : > { %1949 = vmatpush3.bf16.xpose.msra.mxu0 %v1948_v25 }
 0x2f5   : > { %1950 = vmatprep.subr.bf16.mxu0 %v2494_v26 }
 0x2fc   : > { %1952 = vmatpush3.bf16.xpose.msra.mxu0 %v1951_v42 }
 0x2fd   : > { %1953 = vmatprep.subr.bf16.mxu0 %v2494_v26 }
 0x304   : > { %1955 = vmatpush3.bf16.xpose.msra.mxu0 %v1954_v47 }
 0x305   : > { %1956 = vmatprep.subr.bf16.mxu0 %v2494_v26 }
 0x30c   : > { %1958 = vmatpush3.bf16.xpose.msra.mxu0 %v1957_v3 }
 0x30d   : > { %1959 = vmatprep.subr.bf16.mxu0 %v2494_v26 }
 0x314   : > { %1961 = vmatpush3.bf16.xpose.msra.mxu0 %v1960_v43 }
 0x31b   : > { %1837 = vmatmul.mubr.f32.vlgmr.msra.gmra.mrb[0].mxu0 %v2497_v18 }
 0x34f   : > { %v2146_v8 = vpop.permute.xlu0 %2145 }
 0x350   : > { %v2148_v9 = vunpack.i.h.bf16 %v2146_v8  ;;  %v2147_v21 = vunpack.i.l.bf16 %v2146_v8  ;;  %v2157_v10 = vpop.permute.xlu1 %2156 }
 0x351   : > { %v2159_v35 = vunpack.i.h.bf16 %v2157_v10  ;;  %v2158_v50 = vunpack.i.l.bf16 %v2157_v10 }
 0x352   : > { %v1963_v34 = vpack.c.bf16 %v2148_v9, %v2147_v21 }
 0x353   : > { %v2151_v62 = vpop.permute.xlu0 %2150  ;;  %v1969_v51 = vpack.c.bf16 %v2159_v35, %v2158_v50 }
 0x354   : > { %1964 = vmatpush3.bf16.xpose.msra.mxu1 %v1963_v34  ;;  %v2153_v63 = vunpack.i.h.bf16 %v2151_v62  ;;  %v2152_v6 = vunpack.i.l.bf16 %v2151_v62  ;;  %v2162_v11 = vpop.permute.xlu1 %2161 }
 0x355   : > { %1965 = vmatprep.subr.bf16.mxu1 %v2494_v26  ;;  %v2164_v12 = vunpack.i.h.bf16 %v2162_v11  ;;  %v2163_v13 = vunpack.i.l.bf16 %v2162_v11 }
 0x356   : > { %v1966_v49 = vpack.c.bf16 %v2153_v63, %v2152_v6 }
 0x357   : > { %v1972_v14 = vpack.c.bf16 %v2164_v12, %v2163_v13  ;;  %v2167_v15 = vpop.permute.xlu0 %2166 }
 0x358   : > { %v2169_v16 = vunpack.i.h.bf16 %v2167_v15  ;;  %v2168_v17 = vunpack.i.l.bf16 %v2167_v15  ;;  %v2172_v52 = vpop.permute.xlu1 %2171 }
 0x359   : > { %v2174_v53 = vunpack.i.h.bf16 %v2172_v52  ;;  %v2173_v22 = vunpack.i.l.bf16 %v2172_v52 }
 0x35a   : > { %v1975_v20 = vpack.c.bf16 %v2169_v16, %v2168_v17 }
 0x35b   : > { %v1978_v23 = vpack.c.bf16 %v2174_v53, %v2173_v22  ;;  %v2177_v36 = vpop.permute.xlu0 %2176 }
 0x35c   : > { %1967 = vmatpush3.bf16.xpose.msra.mxu1 %v1966_v49  ;;  %v2179_v37 = vunpack.i.h.bf16 %v2177_v36  ;;  %v2178_v38 = vunpack.i.l.bf16 %v2177_v36  ;;  %v2182_v25 = vpop.permute.xlu1 %2181 }
 0x35d   : > { %1968 = vmatprep.subr.bf16.mxu1 %v2494_v26  ;;  %v2184_v54 = vunpack.i.h.bf16 %v2182_v25  ;;  %v2183_v55 = vunpack.i.l.bf16 %v2182_v25 }
 0x35e   : > { %v1981_v24 = vpack.c.bf16 %v2179_v37, %v2178_v38 }
 0x35f   : > { %v1984_v27 = vpack.c.bf16 %v2184_v54, %v2183_v55 }
 0x364   : > { %1970 = vmatpush3.bf16.xpose.msra.mxu1 %v1969_v51 }
 0x365   : > { %1971 = vmatprep.subr.bf16.mxu1 %v2494_v26 }
 0x36c   : > { %1973 = vmatpush3.bf16.xpose.msra.mxu1 %v1972_v14 }
 0x36d   : > { %1974 = vmatprep.subr.bf16.mxu1 %v2494_v26 }
 0x374   : > { %1976 = vmatpush3.bf16.xpose.msra.mxu1 %v1975_v20 }
 0x375   : > { %1977 = vmatprep.subr.bf16.mxu1 %v2494_v26 }
 0x37c   : > { %1979 = vmatpush3.bf16.xpose.msra.mxu1 %v1978_v23 }
 0x37d   : > { %1980 = vmatprep.subr.bf16.mxu1 %v2494_v26 }
 0x384   : > { %1982 = vmatpush3.bf16.xpose.msra.mxu1 %v1981_v24 }
 0x385   : > { %1983 = vmatprep.subr.bf16.mxu1 %v2494_v26 }
 0x38c   : > { %1985 = vmatpush3.bf16.xpose.msra.mxu1 %v1984_v27 }
 0x393   : > { %1872 = vmatmul.mubr.f32.vlgmr.msra.gmra.mrb[0].mxu1 %v2497_v18 }
 0x3ee   : > { %v1127_v39 = vpop.f32.mrb[0].mxu0 }
 0x3ef   : > { %v1131_v40 = vmul.f32 0.0078125, %v1127_v39  ;;  %v1838_v28 = vpop.f32.mrb[1].mxu0 }
 0x3f1   : > { %1132 = vst [vmem:[%s3086_s7] sm:$0x1] %v1131_v40 }
 0x466   : > { %v1295_v29 = vpop.f32.mrb[0].mxu1 }
 0x467   : > { %v1299_v41 = vmul.f32 0.0078125, %v1295_v29  ;;  %v1873_v42 = vpop.f32.mrb[1].mxu1 }
 0x469   : > { %1300 = vst [vmem:[%s3086_s7 + $0x1] sm:$0x1] %v1299_v41 }
 0x46a PF: > { %s3492_s22 = sld [smem:[#allocation23_spill]]  ;;  %s3493_s21 = sld [smem:[#allocation36_spill]] }
 0x46b   : > { %s1343_s29 = sshll.u32 %s3082_s4, 4  ;;  %s3261_s16 = scalar_lea.sflag [#allocation12], %s349_s6  ;;  %s3257_s29 = int_to_ptr.vmem [resolvable:$true] %s1343_s29 }
 0x46c   : > { %s2275_s9 = scalar_lea.vmem %s3257_s29, 2048  ;;  %p3494_p0 = scmp.ne.s32.totalorder %s3473_s1, 0 }
 0x46d   : > { %p2276_p5 = scmp.ne.s32.totalorder %s3257_s29, %s2275_s9  ;;  %s2498_s13 = smov [#allocation11]  }
 0x46e   : > { %s2279_s27 = sshll.u32 %s2498_s13, 4  ;;  %s2280_s27 = int_to_ptr.vmem [resolvable:$false] %s2279_s27 }
 0x46f   : > { %p2277_p12 = pnand %p2276_p5, %p3494_p0  ;;  %s2281_s12 = scalar_lea.vmem %s2280_s27, 4096 }
 0x470   : > { %s1593_s26 = sshll.u32 %s3492_s22, 11  ;;  %p2282_p3 = scmp.lt.s32.totalorder %s3257_s29, %s2280_s27 }
 0x471   : > { %s3254_s30 = scalar_lea.hbm %s3493_s21, %s1593_s26  ;;  %p2278_p7 = pneg %p2277_p12 }
 0x472   : > { %p2283_p2 = scmp.lt.s32.totalorder %s2281_s12, %s2275_s9 }
 0x474   : > { %p2284_p11 = por %p2283_p2, %p2282_p3 }
 0x476   : > { %p2285_p4 = pnand %p2284_p11, %p2278_p7 }
 0x478   : > { %2288 = shalt.err (!%p2285_p4)
}
 0x479   : > { %s2289_s15 = scalar_lea.hbm %s3254_s30, 2048  ;;  %s2293_s24 = scalar_lea.hbm %s3493_s21, 4096 }
 0x47a   : > { %p2290_p10 = scmp.ne.s32.totalorder %s3254_s30, %s2289_s15  ;;  %p2294_p13 = scmp.lt.u32.totalorder %s3254_s30, %s3493_s21 }
 0x47b   : > { %p2295_p6 = scmp.lt.u32.totalorder %s2293_s24, %s2289_s15  ;;  %p2297_p5 = scmp.lt.u32.totalorder %s2289_s15, %s3254_s30 }
 0x47c   : > { %p2291_p9 = pnand %p2290_p10, %p3494_p0 }
 0x47d   : > { %p2296_p8 = por %p2295_p6, %p2294_p13 }
 0x47e   : > { %p2292_p1 = pneg %p2291_p9 }
 0x47f   : > { %p2298_p12 = por %p2297_p5, %p2296_p8 }
 0x481   : > { %p2299_p7 = pnand %p2298_p12, %p2292_p1 }
 0x483   : > { %2302 = shalt.err (!%p2299_p7)
}
 0x484   : > { %s2499_s23 = smov 128   ;;  %s3495_s26 = sld [smem:[#allocation22_spill]] }
 0x485   : > { %s2500_s17 = smov 8   ;;  %s1592_s20 = sshll.u32 %s3492_s22, 5 }
 0x486   : > { %1993 = dma.vmem_to_hbm [thread:$0]  (%p3494_p0), %s3257_s29, 2048, %s3254_s30, %s3261_s16, %s2499_s23, %s2499_s23, %s2500_s17  }
 0x487   : > { %s1327_s9 = sshll.u32 %s2992_s11, 4  ;;  %s3496_s6 = sld [smem:[#allocation35_spill]]  ;;  %s3291_s9 = int_to_ptr.vmem [resolvable:$true] %s1327_s9 }
 0x488   : > { %s3497_s5 = sld [smem:[#allocation37_spill]]  ;;  %s3498_s30 = sand.u32 1, %s2437_s25  }
 0x489   : > { %s3305_s22 = scalar_lea.sflag [#allocation6], %s3498_s30  ;;  %s2303_s11 = scalar_lea.vmem %s3291_s9, 2048 }
 0x48a   : > { %s1324_s13 = sadd.s32 %s3495_s26, %s1592_s20  ;;  %p2304_p3 = scmp.ne.s32.totalorder %s3291_s9, %s2303_s11 }
 0x48b   : > { %s1584_s27 = sshll.u32 %s1324_s13, 7  ;;  %p3499_p2 = scmp.ne.s32.totalorder %s3470_s2, 0 }
 0x48c   : > { %s2501_s29 = smov [#allocation10]  }
 0x48d   : > { %s3296_s4 = scalar_lea.hbm %s3496_s6, %s1584_s27  ;;  %p2305_p11 = pnand %p2304_p3, %p3499_p2 }
 0x48e   : > { %s3301_s10 = scalar_lea.hbm %s3497_s5, %s1592_s20  ;;  %s2307_s26 = sshll.u32 %s2501_s29, 4  ;;  %s2308_s26 = int_to_ptr.vmem [resolvable:$false] %s2307_s26 }
 0x48f   : > { %p2306_p4 = pneg %p2305_p11  ;;  %s2309_s13 = scalar_lea.vmem %s2308_s26, 4096 }
 0x490   : > { %p2310_p10 = scmp.lt.s32.totalorder %s3291_s9, %s2308_s26  ;;  %p2311_p9 = scmp.lt.s32.totalorder %s2309_s13, %s2303_s11 }
 0x492   : > { %p2312_p1 = por %p2311_p9, %p2310_p10 }
 0x494   : > { %p2313_p13 = pnand %p2312_p1, %p2306_p4 }
 0x496   : > { %2316 = shalt.err (!%p2313_p13)
}
 0x497   : > { %s2317_s20 = scalar_lea.hbm %s3296_s4, 2048  ;;  %s2321_s15 = scalar_lea.hbm %s3496_s6, 8192 }
 0x498   : > { %p2318_p6 = scmp.ne.s32.totalorder %s3296_s4, %s2317_s20  ;;  %p2322_p12 = scmp.lt.u32.totalorder %s3296_s4, %s3496_s6 }
 0x499   : > { %p2323_p7 = scmp.lt.u32.totalorder %s2321_s15, %s2317_s20  ;;  %p2325_p11 = scmp.lt.u32.totalorder %s2317_s20, %s3296_s4 }
 0x49a   : > { %p2319_p8 = pnand %p2318_p6, %p3499_p2 }
 0x49b   : > { %p2324_p3 = por %p2323_p7, %p2322_p12 }
 0x49c   : > { %p2320_p5 = pneg %p2319_p8 }
 0x49d   : > { %p2326_p4 = por %p2325_p11, %p2324_p3 }
 0x49f   : > { %p2327_p10 = pnand %p2326_p4, %p2320_p5 }
 0x4a1   : > { %2330 = shalt.err (!%p2327_p10)
}
 0x4a2   : > { %s2502_s30 = smov 256   ;;  %s1359_s11 = sshll.u32 %s3086_s7, 4  ;;  %s1360_s11 = int_to_ptr.vmem [resolvable:$true] %s1359_s11 }
 0x4a3   : > { %1992 = dma.vmem_to_hbm [thread:$0]  (%p3499_p2), %s3291_s9, 2048, %s3296_s4, %s3305_s22, %s2499_s23, %s2502_s30, %s2500_s17  }
 0x4a4   : > { %s2331_s29 = scalar_lea.vmem %s1360_s11, 32  ;;  %s2503_s26 = smov [#allocation13]  }
 0x4a5   : > { %p2332_p9 = scmp.ne.s32.totalorder %s1360_s11, %s2331_s29  ;;  %s2335_s13 = sshll.u32 %s2503_s26, 4  ;;  %s2336_s13 = int_to_ptr.vmem [resolvable:$false] %s2335_s13 }
 0x4a6   : > { %s2337_s20 = scalar_lea.vmem %s2336_s13, 64  ;;  %p2338_p6 = scmp.lt.s32.totalorder %s1360_s11, %s2336_s13 }
 0x4a7   : > { %p2333_p1 = pnand %p2332_p9, %p3494_p0  ;;  %p2339_p8 = scmp.lt.s32.totalorder %s2337_s20, %s2331_s29 }
 0x4a9   : > { %p2334_p13 = pneg %p2333_p1  ;;  %p2340_p5 = por %p2339_p8, %p2338_p6 }
 0x4ab   : > { %p2341_p12 = pnand %p2340_p5, %p2334_p13 }
 0x4ad   : > { %2344 = shalt.err (!%p2341_p12)
}
 0x4ae   : > { %s2345_s2 = scalar_lea.hbm %s3301_s10, 32  ;;  %s2349_s17 = scalar_lea.hbm %s3497_s5, 64 }
 0x4af   : > { %p2346_p2 = scmp.ne.s32.totalorder %s3301_s10, %s2345_s2  ;;  %p2350_p11 = scmp.lt.u32.totalorder %s3301_s10, %s3497_s5 }
 0x4b0   : > { %p2351_p4 = scmp.lt.u32.totalorder %s2349_s17, %s2345_s2  ;;  %p2353_p9 = scmp.lt.u32.totalorder %s2345_s2, %s3301_s10 }
 0x4b1   : > { %p2347_p7 = pnand %p2346_p2, %p3494_p0 }
 0x4b2   : > { %p2352_p10 = por %p2351_p4, %p2350_p11 }
 0x4b3   : > { %p2348_p3 = pneg %p2347_p7 }
 0x4b4   : > { %p2354_p1 = por %p2353_p9, %p2352_p10 }
 0x4b6   : > { %p2355_p13 = pnand %p2354_p1, %p2348_p3 }
 0x4b8   : > { %2358 = shalt.err (!%p2355_p13)
}
 0x4b9   : > { %1994 = dma.vmem_to_hbm [thread:$0]  (%p3494_p0), %s1360_s11, 32, %s3301_s10, %s3261_s16  }
 0x4ba PF: > { %s3500_s22 = sld [smem:[#allocation18_spill]]  ;;  %p2019_p6 = scmp.ge.s32.totalorder %s2485_s14, 2 }
 0x4bb   : > { %p3501_p8 = scmp.ne.s32.totalorder %s3474_s19, 0 }
 0x4bd   : > { %p2009_p5 = pnand %p2019_p6, %p3501_p8 }
 0x4c0   : > { %s1371_s27 = sand.u32 1, %s3500_s22  }
 0x4c1   : > { %s1372_s12 = scalar_lea.sflag [#allocation6], %s1371_s27 }
 0x4c2   : > { %2424 = dma.done.wait (!%p2009_p5), %s1372_s12, 2048  }
 0x4c3   : > { %2426 = vsyncadd (!%p2009_p5), %s1372_s12, 4294965248  ;;  %s3502_s15 = sadd.s32 4294967294, %s2485_s14   ;;  %s3503_s24 = sld [smem:[#allocation31_spill]] }
 0x4c4   : > { %s1380_s18 = sand.u32 1, %s3502_s15  }
 0x4c5   : > { %s1381_s1 = scalar_lea.sflag [#allocation12], %s1380_s18 }
 0x4c9   : > { %p3504_p12 = scmp.ne.s32.totalorder %s3503_s24, 0 }
 0x4cb   : > { %p2012_p2 = pnand %p2019_p6, %p3504_p12 }
 0x4cd   : > { %2428 = dma.done.wait (!%p2012_p2), %s1381_s1, 2080  }
 0x4ce   : > { %2430 = vsyncadd (!%p2012_p2), %s1381_s1, 4294965216  ;;  %s30_s14 = sadd.s32 1, %s2485_s14   ;;  %s3506_s19 = sld [smem:[#allocation19_spill]] }
 0x4cf   : > { %p3359_p0 = scmp.ge.s32.totalorder %s30_s14, 6   ;;  %s3507_s26 = sld [smem:[#allocation30_spill]] }
 0x4d0   : > { %s3508_s16 = sld [smem:[#allocation20_spill]]  ;;  %s3509_s29 = sld [smem:[#allocation27_spill]] }
 0x4d1   : > { %s3510_s11 = sld [smem:[#allocation21_spill]]  ;;  %s3511_s9 = sld [smem:[#allocation29_spill]] }
 0x4d2   : > { %s3512_s13 = sld [smem:[#allocation24_spill]]  ;;  %s3513_s20 = sld [smem:[#allocation25_spill]] }
 0x4d3   : > { %s3514_s12 = sld [smem:[#allocation26_spill]]  ;;  %s3515_s2 = sld [smem:[#allocation28_spill]] }
 0x4d4   : > { %s3517_s24 = smov %s2437_s25  ;;  %s3518_s25 = smov %s3506_s19 }
 0x4d5   : > { %s3519_s27 = smov %s2449_s28  ;;  %s3521_s30 = smov %s2461_s8 }
 0x4d6   : > { %s3520_s28 = smov %s3508_s16  ;;  %29 = sbr.rel (!%p3359_p0) target bundleno = 21 (0x15), region = 156 }
 0x4d7   : > { %s3522_s8 = smov %s3510_s11 }
 0x4d8   : > { %s3523_s10 = smov %s3512_s13  ;;  %s3524_s11 = smov %s3513_s20 }
 0x4d9   : > { %s3525_s13 = smov %s3515_s2 }
 0x4dd   :  { %1395 = vsyncpa [#allocation5], 1 }
 0x4de   :  { %1397 = vsyncpa [#allocation5 + $0x1], 1 }
 0x4df   :  { %1398 = vsyncpa [#allocation8], 1 }
 0x4e0   :  { %1400 = vsyncpa [#allocation8 + $0x1], 1 }
 0x4e1   :  { %1401 = vsyncpa [#allocation6], 1 }
 0x4e2   :  { %1403 = vsyncpa [#allocation6 + $0x1], 1 }
 0x4e3   :  { %1404 = vsyncpa [#allocation12], 1 }
 0x4e4   :  { %1406 = vsyncpa [#allocation12 + $0x1], 1 }

</bundles_post_ra>
